<compile_context>
chip_gen: v5e
topology: v5e:2x2
jax: 0.10.0
libtpu: 0.0.40
codegen_flags: <defaults>
</compile_context>

<pallas_src>
import functools
import math

import jax
import jax.numpy as jnp
from jax.experimental import pallas as pl
from jax.experimental.pallas import tpu as pltpu


def _round_up(x: int, m: int) -> int:
    return ((x + m - 1) // m) * m


# --------------------------------------------------------------------------- #
# Hardware probing (best-effort, safe fallbacks everywhere)
# --------------------------------------------------------------------------- #
@functools.lru_cache(maxsize=1)
def _hw_config():
    vmem_cap = 128 * 1024 * 1024
    try:
        info = pltpu.get_tpu_info()
        vmem_cap = int(getattr(info, "vmem_capacity_bytes", vmem_cap))
    except Exception:
        pass
    kind = ""
    try:
        kind = jax.devices()[0].device_kind.lower()
    except Exception:
        pass
    small_vmem = (vmem_cap <= 96 * 1024 * 1024) or ("v7" in kind)  # v7x: 64 MiB/TC
    return {
        # v6e/v7x have 256x256 MXUs: 256-granular N padding only pays off for
        # genuinely wide layers; v5e keeps 128 (native 128x128 MXU).
        "mxu_256": ("v6" in kind) or ("v7" in kind),
        # Fat batch tiles on 128-MiB chips; stay smaller on v7x (64 MiB VMEM).
        "default_block_m": 256 if small_vmem else 512,
        # Never request the full physical VMEM (esp. v7x's 64 MiB).
        "vmem_limit_cap": (48 if small_vmem else 100) * 1024 * 1024,
    }


@functools.lru_cache(maxsize=1)
def _supports_single_buffering() -> bool:
    """One-time probe: does this jax build accept pipeline_mode=pl.Buffered(1)?"""
    try:
        def _k(x_ref, o_ref):
            o_ref[...] = x_ref[...]
        f = pl.pallas_call(
            _k,
            out_shape=jax.ShapeDtypeStruct((8, 128), jnp.float32),
            grid=(1,),
            in_specs=[pl.BlockSpec((8, 128), lambda i: (0, 0),
                                   pipeline_mode=pl.Buffered(1))],
            out_specs=pl.BlockSpec((8, 128), lambda i: (0, 0)),
        )
        jax.block_until_ready(f(jnp.zeros((8, 128), jnp.float32)))
        return True
    except Exception:
        return False


# --------------------------------------------------------------------------- #
# One-time parameter preparation (padding happens here, NOT per forward call)
# --------------------------------------------------------------------------- #
def prepare_mlp_params(params, *, mxu_256=None):
    """Zero-pad each layer's weight/bias to lane-aligned widths.  Call ONCE and
    reuse.  Padding is exact: padded weight rows/cols and bias entries are zero
    and SiLU(0) = 0, so padded columns carry zeros through every layer."""
    if mxu_256 is None:
        mxu_256 = _hw_config()["mxu_256"]

    def lane_pad(n):
        g = 256 if (mxu_256 and n >= 256) else 128
        return _round_up(n, g)

    in_f = params[0][0].shape[0]
    out_f = params[-1][0].shape[1]
    k_pad = _round_up(in_f, 128)          # must match the (uncopied) x layout
    padded = []
    for (w, b) in params:
        k, n = w.shape
        assert b.shape == (1, n)
        n_pad = lane_pad(n)
        w_p = jnp.zeros((k_pad, n_pad), w.dtype).at[:k, :n].set(w)
        b_p = jnp.zeros((1, n_pad), b.dtype).at[:, :n].set(b)
        padded.append((w_p, b_p))
        k_pad = n_pad
    return padded, in_f, out_f


# --------------------------------------------------------------------------- #
# Kernel
# --------------------------------------------------------------------------- #
def _mlp_fused_kernel(*refs, num_layers: int):
    """Whole MLP on one VMEM-resident batch tile.

    refs = (x_ref, w0, b0, w1, b1, ..., w{L-1}, b{L-1}, o_ref).
    Weight/bias feature dims are pre-padded with zeros (exact math); the final
    store keeps only the true output columns.
    """
    x_ref, o_ref = refs[0], refs[-1]

    h = x_ref[...]                                        # (TM, K0), input dtype
    for li in range(num_layers):
        w_ref = refs[1 + 2 * li]
        b_ref = refs[2 + 2 * li]
        y = jnp.dot(h.astype(w_ref.dtype), w_ref[...],
                    preferred_element_type=jnp.float32)   # MXU, f32 accumulation
        y = y + b_ref[...].astype(jnp.float32)            # bias add in f32
        if li != num_layers - 1:
            y = y * jax.nn.sigmoid(y)                     # SiLU (EUP), f32
        h = y                                             # never leaves VMEM
    # TODO(synk): for wide hidden layers (>~1k cols) stage `h` through a VMEM
    # scratch ref, and add a K/N reduction grid axis ('arbitrary', last) with a
    # pl.when-initialized f32 accumulator so resident weights stay under the
    # VMEM budget (esp. v7x's 64 MiB).
    o_ref[...] = h[:, : o_ref.shape[-1]].astype(o_ref.dtype)


# --------------------------------------------------------------------------- #
# Wrapper
# --------------------------------------------------------------------------- #
def mlp_forward_fused(x, padded_params, out_features, *, block_m=None,
                      out_dtype=None):
    """Fused forward of Linear+SiLU layers (last layer has no activation).

    x:             [B, In]  (In may be unpadded; no copy if In % 128 == 0)
    padded_params: output of prepare_mlp_params()
    Returns        [B, out_features] in x.dtype (or out_dtype).
    """
    batch, in_f = x.shape
    num_layers = len(padded_params)
    hw = _hw_config()
    if block_m is None:
        block_m = hw["default_block_m"]
    if out_dtype is None:
        out_dtype = x.dtype

    # --- input features: fast path = no copy at all ------------------------- #
    in_pad = padded_params[0][0].shape[0]
    if in_f != in_pad:
        # Fallback only when in_features isn't a multiple of 128 (the spec's
        # input_size=128 never takes this branch).
        x = jnp.pad(x, ((0, 0), (0, in_pad - in_f)))

    # --- batch tiling: fat tiles, but keep grid >= 2 for megacore / v7x ----- #
    if batch <= 8:
        tm = batch                                # block == full dim is allowed
    else:
        tm = min(block_m, _round_up(batch, 8))
        if pl.cdiv(batch, tm) < 2:
            tm = _round_up(pl.cdiv(batch, 2), 8)  # give both TensorCores work
    grid = (pl.cdiv(batch, tm),)
    # A ragged last tile is handled by Pallas partial blocks: rows are
    # independent and out-of-range output rows are dropped on store.

    # --- VMEM budget & cost estimate ----------------------------------------- #
    x_item = jnp.dtype(x.dtype).itemsize
    o_item = jnp.dtype(out_dtype).itemsize
    max_np = max(w.shape[1] for (w, _) in padded_params)
    w_bytes = sum(w.size * jnp.dtype(w.dtype).itemsize
                  + b.size * jnp.dtype(b.dtype).itemsize
                  for (w, b) in padded_params)
    vmem_needed = (2 * tm * in_pad * x_item          # double-buffered x tile
                   + 2 * tm * out_features * o_item  # double-buffered out tile
                   + w_bytes                         # (single-buffered) weights
                   + 4 * tm * max_np * 4)            # f32 intermediates slack
    vmem_limit = int(min(hw["vmem_limit_cap"],
                         max(32 * 1024 * 1024, 2 * vmem_needed)))

    flops = 2 * batch * sum(w.shape[0] * w.shape[1] for (w, _) in padded_params)
    transcendentals = batch * sum(w.shape[1] for (w, _) in padded_params[:-1])
    bytes_accessed = (batch * in_pad * x_item + w_bytes
                      + batch * out_features * o_item)
    cost = pl.CostEstimate(flops=flops, transcendentals=transcendentals,
                           bytes_accessed=bytes_accessed)

    # --- BlockSpecs ----------------------------------------------------------- #
    const_kw = ({"pipeline_mode": pl.Buffered(1)}
                if _supports_single_buffering() else {})
    in_specs = [pl.BlockSpec((tm, in_pad), lambda i: (i, 0))]
    flat_params = []
    for (w_p, b_p) in padded_params:
        kd, nd = w_p.shape
        # Grid-invariant params: single-buffer them (pure VMEM waste otherwise).
        in_specs.append(pl.BlockSpec((kd, nd), lambda i: (0, 0), **const_kw))
        in_specs.append(pl.BlockSpec((1, nd), lambda i: (0, 0), **const_kw))
        flat_params.extend([w_p, b_p])

    kernel = functools.partial(_mlp_fused_kernel, num_layers=num_layers)
    out = pl.pallas_call(
        kernel,
        out_shape=jax.ShapeDtypeStruct((batch, out_features), out_dtype),
        grid=grid,
        in_specs=in_specs,
        out_specs=pl.BlockSpec((tm, out_features), lambda i: (i, 0)),
        compiler_params=pltpu.CompilerParams(
            dimension_semantics=("parallel",),   # batch tiles shard over TCs
            vmem_limit_bytes=vmem_limit,
        ),
        cost_estimate=cost,
    )(x, *flat_params)
    return out


# --------------------------------------------------------------------------- #
# Init + reference
# --------------------------------------------------------------------------- #
def init_mlp_params(key, input_size, hidden_layers, output_size,
                    dtype=jnp.float32):
    """Deterministic parameter init (uniform, torch-default scale)."""
    sizes = [input_size] + list(hidden_layers) + [output_size]
    params = []
    for idx, (fan_in, fan_out) in enumerate(zip(sizes[:-1], sizes[1:])):
        kw, kb, key = jax.random.split(jax.random.fold_in(key, idx), 3)
        bound = 1.0 / (fan_in ** 0.5)
        w = jax.random.uniform(kw, (fan_in, fan_out), dtype, -bound, bound)
        b = jax.random.uniform(kb, (1, fan_out), dtype, -bound, bound)
        params.append((w, b))
    return params


def mlp_forward_ref(x, params):
    """Pure-JAX reference (f32)."""
    n_layers = len(params)
    x = x.astype(jnp.float32)
    for li, (w, b) in enumerate(params):
        y = x @ w.astype(jnp.float32) + b.astype(jnp.float32)
        if li != n_layers - 1:
            y = y * jax.nn.sigmoid(y)
        x = y
    return x


if __name__ == "__main__":
    key = jax.random.PRNGKey(0)
    kx, kp = jax.random.split(key)

    batch = 256                  # >= 2 batch tiles -> real grid + megacore
    input_size = 128             # matches the spec's input_size (lane aligned)
    hidden_layers = [64, 32]
    output_size = 16

    x = jax.random.normal(kx, (batch, input_size), dtype=jnp.float32)
    params = init_mlp_params(kp, input_size, hidden_layers, output_size)
    padded_params, in_f, out_f = prepare_mlp_params(params)   # pad params ONCE

    ref = mlp_forward_ref(x, params)

    # f32 path, aligned shapes: no wrapper-side pad/copy of x, no output slice.
    out = jax.block_until_ready(mlp_forward_fused(x, padded_params, out_f))
    assert out.shape == (batch, output_size)
    assert jnp.allclose(out, ref, atol=1e-5, rtol=1e-5)

    # Ragged batch: exercises the partial-last-tile path (still no x copy).
    out_r = jax.block_until_ready(mlp_forward_fused(x[:200], padded_params, out_f))
    assert out_r.shape == (200, output_size)
    assert jnp.allclose(out_r, ref[:200], atol=1e-5, rtol=1e-5)

    # bf16 params/activations (MXU fast path on all generations, incl. v5e).
    params_bf16 = [(w.astype(jnp.bfloat16), b.astype(jnp.bfloat16))
                   for (w, b) in params]
    padded_bf16, _, _ = prepare_mlp_params(params_bf16)
    out_bf16 = jax.block_until_ready(
        mlp_forward_fused(x.astype(jnp.bfloat16), padded_bf16, out_f))
    assert jnp.allclose(out_bf16.astype(jnp.float32), ref, atol=5e-2, rtol=5e-2)

    print("KERNEL_OK")
</pallas_src>

<mosaic_0001>
module attributes {stable_mosaic.version = 11 : i64} {
  func.func @_k(%arg0: i32, %arg1: memref<8x128xf32, #tpu.memory_space<vmem>>, %arg2: memref<8x128xf32, #tpu.memory_space<vmem>>) attributes {dimension_semantics = [#tpu.dimension_semantics<arbitrary>], iteration_bounds = array<i64: 1>, scalar_prefetch = 0 : i64, scratch_operands = 0 : i64, tpu.core_type = #tpu.core_type<tc>, window_params = [{pipeline_mode = #tpu.pipeline_mode<synchronous>, transform_indices = @transform_0, window_bounds = array<i64: 8, 128>}, {pipeline_mode = #tpu.pipeline_mode<synchronous>, transform_indices = @transform_1, window_bounds = array<i64: 8, 128>}]} {
    %c0 = arith.constant 0 : index
    %c0_0 = arith.constant 0 : index
    %0 = vector.load %arg1[%c0, %c0_0] : memref<8x128xf32, #tpu.memory_space<vmem>>, vector<8x128xf32>
    %c0_1 = arith.constant 0 : index
    %c0_2 = arith.constant 0 : index
    %1 = vector.load %arg2[%c0_1, %c0_2] : memref<8x128xf32, #tpu.memory_space<vmem>>, vector<8x128xf32>
    tpu.vector_store %arg2[%c0_1, %c0_2], %0 {strides = array<i32>} : memref<8x128xf32, #tpu.memory_space<vmem>>, vector<8x128xf32>,
    return
  }
  func.func @transform_0(%arg0: i32) -> (i32, i32) {
    %c0_i32 = arith.constant 0 : i32
    %c0_i32_0 = arith.constant 0 : i32
    %c0_i32_1 = arith.constant 0 : i32
    return %c0_i32, %c0_i32_0 : i32, i32
  }
  func.func @transform_1(%arg0: i32) -> (i32, i32) {
    %c0_i32 = arith.constant 0 : i32
    %c0_i32_0 = arith.constant 0 : i32
    %c0_i32_1 = arith.constant 0 : i32
    return %c0_i32, %c0_i32_0 : i32, i32
  }
}

module attributes {stable_mosaic.version = 11 : i64} {
  func.func @_mlp_fused_kernel(%arg0: i32, %arg1: memref<128x128xf32, #tpu.memory_space<vmem>>, %arg2: memref<128x128xf32, #tpu.memory_space<vmem>>, %arg3: memref<1x128xf32, #tpu.memory_space<vmem>>, %arg4: memref<128x128xf32, #tpu.memory_space<vmem>>, %arg5: memref<1x128xf32, #tpu.memory_space<vmem>>, %arg6: memref<128x128xf32, #tpu.memory_space<vmem>>, %arg7: memref<1x128xf32, #tpu.memory_space<vmem>>, %arg8: memref<128x16xf32, #tpu.memory_space<vmem>>) attributes {dimension_semantics = [#tpu.dimension_semantics<parallel>], iteration_bounds = array<i64: 2>, scalar_prefetch = 0 : i64, scratch_operands = 0 : i64, tpu.core_type = #tpu.core_type<tc>, window_params = [{transform_indices = @transform_0, window_bounds = array<i64: 128, 128>}, {pipeline_mode = #tpu.pipeline_mode<synchronous>, transform_indices = @transform_1, window_bounds = array<i64: 128, 128>}, {pipeline_mode = #tpu.pipeline_mode<synchronous>, transform_indices = @transform_2, window_bounds = array<i64: 1, 128>}, {pipeline_mode = #tpu.pipeline_mode<synchronous>, transform_indices = @transform_3, window_bounds = array<i64: 128, 128>}, {pipeline_mode = #tpu.pipeline_mode<synchronous>, transform_indices = @transform_4, window_bounds = array<i64: 1, 128>}, {pipeline_mode = #tpu.pipeline_mode<synchronous>, transform_indices = @transform_5, window_bounds = array<i64: 128, 128>}, {pipeline_mode = #tpu.pipeline_mode<synchronous>, transform_indices = @transform_6, window_bounds = array<i64: 1, 128>}, {transform_indices = @transform_7, window_bounds = array<i64: 128, 16>}]} {
    %c0 = arith.constant 0 : index
    %c0_0 = arith.constant 0 : index
    %0 = vector.load %arg1[%c0, %c0_0] : memref<128x128xf32, #tpu.memory_space<vmem>>, vector<128x128xf32>
    %c0_1 = arith.constant 0 : index
    %c0_2 = arith.constant 0 : index
    %1 = vector.load %arg2[%c0_1, %c0_2] : memref<128x128xf32, #tpu.memory_space<vmem>>, vector<128x128xf32>
    %cst = arith.constant dense<0.000000e+00> : vector<128x128xf32>
    %2 = tpu.matmul %0, %1, %cst {dimension_numbers = #tpu.dot_dimension_numbers<[1], [0], [0], [1], [0, 0, 1, 1], [], []>} : vector<128x128xf32>, vector<128x128xf32>, vector<128x128xf32> -> vector<128x128xf32>
    %c0_3 = arith.constant 0 : index
    %c0_4 = arith.constant 0 : index
    %3 = vector.load %arg3[%c0_3, %c0_4] : memref<1x128xf32, #tpu.memory_space<vmem>>, vector<1x128xf32>
    %4 = vector.broadcast %3 : vector<1x128xf32> to vector<128x128xf32>
    %5 = arith.addf %2, %4 : vector<128x128xf32>
    %6 = arith.negf %5 : vector<128x128xf32>
    %7 = math.exp %6 : vector<128x128xf32>
    %cst_5 = arith.constant 1.000000e+00 : f32
    %8 = vector.broadcast %cst_5 : f32 to vector<128x128xf32>
    %9 = arith.addf %8, %7 : vector<128x128xf32>
    %10 = arith.divf %8, %9 : vector<128x128xf32>
    %11 = arith.mulf %5, %10 : vector<128x128xf32>
    %c0_6 = arith.constant 0 : index
    %c0_7 = arith.constant 0 : index
    %12 = vector.load %arg4[%c0_6, %c0_7] : memref<128x128xf32, #tpu.memory_space<vmem>>, vector<128x128xf32>
    %cst_8 = arith.constant dense<0.000000e+00> : vector<128x128xf32>
    %13 = tpu.matmul %11, %12, %cst_8 {dimension_numbers = #tpu.dot_dimension_numbers<[1], [0], [0], [1], [0, 0, 1, 1], [], []>} : vector<128x128xf32>, vector<128x128xf32>, vector<128x128xf32> -> vector<128x128xf32>
    %c0_9 = arith.constant 0 : index
    %c0_10 = arith.constant 0 : index
    %14 = vector.load %arg5[%c0_9, %c0_10] : memref<1x128xf32, #tpu.memory_space<vmem>>, vector<1x128xf32>
    %15 = vector.broadcast %14 : vector<1x128xf32> to vector<128x128xf32>
    %16 = arith.addf %13, %15 : vector<128x128xf32>
    %17 = arith.negf %16 : vector<128x128xf32>
    %18 = math.exp %17 : vector<128x128xf32>
    %cst_11 = arith.constant 1.000000e+00 : f32
    %19 = vector.broadcast %cst_11 : f32 to vector<128x128xf32>
    %20 = arith.addf %19, %18 : vector<128x128xf32>
    %21 = arith.divf %19, %20 : vector<128x128xf32>
    %22 = arith.mulf %16, %21 : vector<128x128xf32>
    %c0_12 = arith.constant 0 : index
    %c0_13 = arith.constant 0 : index
    %23 = vector.load %arg6[%c0_12, %c0_13] : memref<128x128xf32, #tpu.memory_space<vmem>>, vector<128x128xf32>
    %cst_14 = arith.constant dense<0.000000e+00> : vector<128x128xf32>
    %24 = tpu.matmul %22, %23, %cst_14 {dimension_numbers = #tpu.dot_dimension_numbers<[1], [0], [0], [1], [0, 0, 1, 1], [], []>} : vector<128x128xf32>, vector<128x128xf32>, vector<128x128xf32> -> vector<128x128xf32>
    %c0_15 = arith.constant 0 : index
    %c0_16 = arith.constant 0 : index
    %25 = vector.load %arg7[%c0_15, %c0_16] : memref<1x128xf32, #tpu.memory_space<vmem>>, vector<1x128xf32>
    %26 = vector.broadcast %25 : vector<1x128xf32> to vector<128x128xf32>
    %27 = arith.addf %24, %26 : vector<128x128xf32>
    %28 = vector.extract_strided_slice %27 {offsets = [0, 0], sizes = [128, 16], strides = [1, 1]} : vector<128x128xf32> to vector<128x16xf32>
    %c0_17 = arith.constant 0 : index
    %c0_18 = arith.constant 0 : index
    %29 = vector.load %arg8[%c0_17, %c0_18] : memref<128x16xf32, #tpu.memory_space<vmem>>, vector<128x16xf32>
    tpu.vector_store %arg8[%c0_17, %c0_18], %28 {strides = array<i32>} : memref<128x16xf32, #tpu.memory_space<vmem>>, vector<128x16xf32>,
    return
  }
  func.func @transform_0(%arg0: i32) -> (i32, i32) {
    %c0_i32 = arith.constant 0 : i32
    %c0_i32_0 = arith.constant 0 : i32
    return %arg0, %c0_i32 : i32, i32
  }
  func.func @transform_1(%arg0: i32) -> (i32, i32) {
    %c0_i32 = arith.constant 0 : i32
    %c0_i32_0 = arith.constant 0 : i32
    %c0_i32_1 = arith.constant 0 : i32
    return %c0_i32, %c0_i32_0 : i32, i32
  }
  func.func @transform_2(%arg0: i32) -> (i32, i32) {
    %c0_i32 = arith.constant 0 : i32
    %c0_i32_0 = arith.constant 0 : i32
    %c0_i32_1 = arith.constant 0 : i32
    return %c0_i32, %c0_i32_0 : i32, i32
  }
  func.func @transform_3(%arg0: i32) -> (i32, i32) {
    %c0_i32 = arith.constant 0 : i32
    %c0_i32_0 = arith.constant 0 : i32
    %c0_i32_1 = arith.constant 0 : i32
    return %c0_i32, %c0_i32_0 : i32, i32
  }
  func.func @transform_4(%arg0: i32) -> (i32, i32) {
    %c0_i32 = arith.constant 0 : i32
    %c0_i32_0 = arith.constant 0 : i32
    %c0_i32_1 = arith.constant 0 : i32
    return %c0_i32, %c0_i32_0 : i32, i32
  }
  func.func @transform_5(%arg0: i32) -> (i32, i32) {
    %c0_i32 = arith.constant 0 : i32
    %c0_i32_0 = arith.constant 0 : i32
    %c0_i32_1 = arith.constant 0 : i32
    return %c0_i32, %c0_i32_0 : i32, i32
  }
  func.func @transform_6(%arg0: i32) -> (i32, i32) {
    %c0_i32 = arith.constant 0 : i32
    %c0_i32_0 = arith.constant 0 : i32
    %c0_i32_1 = arith.constant 0 : i32
    return %c0_i32, %c0_i32_0 : i32, i32
  }
  func.func @transform_7(%arg0: i32) -> (i32, i32) {
    %c0_i32 = arith.constant 0 : i32
    %c0_i32_0 = arith.constant 0 : i32
    return %arg0, %c0_i32 : i32, i32
  }
}

</mosaic_0001>

<bundles_post_ra>
// kernel: tpu_custom_call.1
= control target key start
LH: loop header
LB: loop body
LE: loop exit
PB: predicated region body
PF: predicated region fallthrough
CT: control target
= control target key end

     0   :  { %6 = vsyncpa [#allocation3], 0  ;;  %s114_s0 = inlined_call_operand.hbm [shape: f32[8,128], index: 0, kind: input, shape index: {}]   ;;  %s115_s1 = inlined_call_operand.hbm [shape: f32[8,128], index: 1, kind: output, shape index: {}]  }
   0x1   :  { %7 = vsyncpa [#allocation4], 0  ;;  %s13_s8 = sshll.u32 %s114_s0, 4  ;;  %s96_s9 = smov [#allocation2]   ;;  %s14_s8 = int_to_ptr.hbm [resolvable:$true] %s13_s8 }
   0x2   :  { %s15_s10 = sshll.u32 %s96_s9, 4  ;;  %s16_s10 = int_to_ptr.vmem [resolvable:$true] %s15_s10 }
   0x3   :  { %18 = dma.hbm_to_vmem [thread:$0]  %s14_s8, 128, %s16_s10, [#allocation3]  }
   0x4   :  { %92 = dma.done.wait [#allocation3], 128  }
   0x5   :  { %93 = vsyncadd [#allocation3], 4294967168  ;;  %s97_s11 = smov [#allocation5]   ;;  %s32_s15 = sshll.u32 %s115_s1, 4  ;;  %v23_v0 = vld [vmem:[#allocation2] sm:$0xff]  ;;  %s33_s15 = int_to_ptr.hbm [resolvable:$true] %s32_s15 }
   0x6   :  { %s30_s12 = sshll.u32 %s97_s11, 4  ;;  %24 = vst [vmem:[#allocation5] sm:$0xff] %v23_v0  ;;  %s31_s12 = int_to_ptr.vmem [resolvable:$true] %s30_s12 }
   0x7   :  { %35 = dma.vmem_to_hbm [thread:$0]  %s31_s12, 128, %s33_s15, [#allocation4]  }
   0x8   :  { %94 = dma.done.wait [#allocation4], 128  }
   0x9   :  { %95 = vsyncadd [#allocation4], 4294967168 }
   0xa   :  { %40 = vsyncpa [#allocation3], 1 }
   0xb   :  { %41 = vsyncpa [#allocation4], 1 }

// kernel: tpu_custom_call.1
= control target key start
LH: loop header
LB: loop body
LE: loop exit
PB: predicated region body
PF: predicated region fallthrough
CT: control target
= control target key end

     0   :  { %12 = vsyncpa [#allocation3], 0  ;;  %s2504_s0 = inlined_call_operand.hbm [shape: f32[256,128], index: 0, kind: input, shape index: {}]   ;;  %s2505_s1 = inlined_call_operand.hbm [shape: f32[128,128], index: 1, kind: input, shape index: {}]   ;;  %s2506_s2 = inlined_call_operand.vmem [shape: f32[1,128], index: 2, kind: input, shape index: {}]   ;;  %s2507_s3 = inlined_call_operand.hbm [shape: f32[128,128], index: 3, kind: input, shape index: {}]   ;;  %s2508_s4 = inlined_call_operand.vmem [shape: f32[1,128], index: 4, kind: input, shape index: {}]   ;;  %s2509_s5 = inlined_call_operand.hbm [shape: f32[128,128], index: 5, kind: input, shape index: {}]   ;;  %s2510_s6 = inlined_call_operand.vmem [shape: f32[1,128], index: 6, kind: input, shape index: {}]   ;;  %s2511_s7 = inlined_call_operand.vmem [shape: f32[256,16], index: 7, kind: output, shape index: {}]  }
   0x1   :  { %14 = vsyncpa [#allocation3 + $0x1], 0 }
   0x2   :  { %15 = vsyncpa [#allocation5], 0 }
   0x3   :  { %16 = vsyncpa [#allocation8], 0  ;;  %s1889_s24 = smov 0   ;;  %s1891_s25 = smov 0  }
   0x4   :  { %s1893_s26 = smov 0   ;;  %s1895_s27 = smov 0  }
   0x5 LB: > { %s2512_s28 = sadd.s32 4294967295, %s1842_s27   ;;  %p42_p0 = scmp.ne.s32.totalorder %s1834_s25, %s1830_s24  ;;  %s1842_s27 = sphi %s1895_s27, %s2554_s27   ;;  %s1838_s26 = sphi %s1893_s26, %s2553_s26   ;;  %s1834_s25 = sphi %s1891_s25, %s2552_s25   ;;  %s1830_s24 = sphi %s1889_s24, %s2551_s24  }
   0x6   : > { %p1911_p1 = scmp.eq.s32.totalorder %s2512_s28, 0  ;;  %p1379_p2 = scmp.ge.s32.totalorder %s1842_s27, 1 }
   0x7   : > { %p205_p3 = scmp.lt.s32.totalorder %s1842_s27, 3  ;;  %s216_s10 = sshll.u32 %s2505_s1, 4  ;;  %s217_s10 = int_to_ptr.hbm [resolvable:$true] %s216_s10 }
   0x8   : > { %p1919_p4 = por %p1911_p1, %p42_p0  ;;  %s1844_s12 = smov [#allocation4]  }
   0x9   : > { %p1926_p5 = pnand %p1379_p2, %p205_p3  ;;  %s218_s13 = sshll.u32 %s1844_s12, 4  ;;  %s219_s13 = int_to_ptr.vmem [resolvable:$true] %s218_s13 }
   0xa   : > { %s233_s17 = sshll.u32 %s2507_s3, 4  ;;  %s1845_s18 = smov 128   ;;  %s234_s17 = int_to_ptr.hbm [resolvable:$true] %s233_s17 }
   0xb   : > { %p1491_p6 = pneg %p1926_p5  ;;  %s1846_s19 = smov 8  }
   0xc   : > { %s1847_s20 = smov [#allocation6]   ;;  %s250_s24 = sshll.u32 %s2509_s5, 4  ;;  %s251_s24 = int_to_ptr.hbm [resolvable:$true] %s250_s24 }
   0xd   : > { %p1934_p7 = pnand %p1491_p6, %p1911_p1  ;;  %s235_s21 = sshll.u32 %s1847_s20, 4  ;;  %s236_s21 = int_to_ptr.vmem [resolvable:$true] %s235_s21 }
   0xe   : > { %s1848_s8 = smov [#allocation7]   ;;  %p36_p9 = scmp.ne.s32.totalorder %s1838_s26, %s1834_s25 }
   0xf   : > { %1494 = dma.hbm_to_vmem [thread:$0]  (!%p1934_p7), %s217_s10, 2048, %s219_s13, [#allocation5], %s1845_s18, %s1845_s18, %s1846_s19  }
  0x10   : > { %1497 = dma.hbm_to_vmem [thread:$0]  (!%p1934_p7), %s234_s17, 2048, %s236_s21, [#allocation5], %s1845_s18, %s1845_s18, %s1846_s19  }
  0x11   : > { %s252_s9 = sshll.u32 %s1848_s8, 4  ;;  %s1955_s10 = sadd.s32 1, %s1842_s27   ;;  %s253_s9 = int_to_ptr.vmem [resolvable:$true] %s252_s9 }
  0x12   : > { %1500 = dma.hbm_to_vmem [thread:$0]  (!%p1934_p7), %s251_s24, 2048, %s253_s9, [#allocation8], %s1845_s18, %s1845_s18, %s1846_s19  }
  0x13   : > { %s26_s12 = ssub.s32 %s1842_s27, %s1955_s10  ;;  %s29_s13 = sadd.s32 1, %s1838_s26 }
  0x14   : > { %p27_p8 = scmp.eq.s32.totalorder %s26_s12, 0  ;;  %p37_p10 = scmp.eq.s32.totalorder %s1842_s27, 0 }
  0x15   : > { %p1508_p11 = scmp.lt.s32.totalorder %s1842_s27, 2  ;;  %s269_s16 = sand.u32 1, %s1838_s26  }
  0x16   : > { %s1970_s15 = scalar_select %p27_p8, %s1838_s26, %s29_s13  }
  0x17   : > { %p38_p12 = por %p37_p10, %p36_p9  ;;  %s1384_s17 = sshll.u32 %s269_s16, 7 }
  0x18   : > { %s1428_s20 = sshll.u32 %s1842_s27, 7  ;;  %s273_s23 = scalar_lea.vmem [#allocation2], %s1384_s17 }
  0x19   : > { %s278_s14 = scalar_lea.hbm %s2504_s0, %s1428_s20  ;;  %s281_s8 = sshll.u32 %s273_s23, 4  ;;  %s282_s8 = int_to_ptr.vmem [resolvable:$true] %s281_s8 }
  0x1a   : > { %s279_s28 = sshll.u32 %s278_s14, 4  ;;  %p1977_p13 = pnand %p1508_p11, %p38_p12  ;;  %s280_s28 = int_to_ptr.hbm [resolvable:$true] %s279_s28 }
  0x1b   : > { %s270_s9 = scalar_lea.sflag [#allocation3], %s269_s16  ;;  %s1770_s12 = sshra.s32 %s280_s28, 4  ;;  %s1771_s12 = int_to_ptr.hbm [resolvable:$true] %s1770_s12 }
  0x1c   : > { %s1772_s13 = scalar_lea.hbm %s1771_s12, 128  ;;  %p1774_p2 = pneg %p1977_p13 }
  0x1d   : > { %p1773_p0 = scmp.ne.s32.totalorder %s1771_s12, %s1772_s13  ;;  %s1777_s21 = scalar_lea.hbm %s2504_s0, 256 }
  0x1e   : > { %p1778_p7 = scmp.lt.s32.totalorder %s1771_s12, %s2504_s0  ;;  %p1779_p8 = scmp.lt.s32.totalorder %s1777_s21, %s1772_s13 }
  0x1f   : > { %p1775_p3 = pnand %p1774_p2, %p1773_p0 }
  0x20   : > { %p1780_p9 = por %p1779_p8, %p1778_p7 }
  0x21   : > { %p1776_p6 = pneg %p1775_p3 }
  0x23   : > { %p1781_p10 = pnand %p1780_p9, %p1776_p6 }
  0x25   : > { %1784 = shalt.err (!%p1781_p10)
}
  0x26   : > { %1504 = dma.hbm_to_vmem [thread:$0]  (!%p1977_p13), %s280_s28, 2048, %s282_s8, %s270_s9, %s1845_s18, %s1845_s18, %s1846_s19  }
  0x27   : > { %293 = sbr.rel (%p1926_p5) target bundleno = 623 (0x26f), region = 48  ;;  %s295_s16 = sand.u32 (!%p1926_p5), 1, %s1834_s25  }
  0x28   : > { %s1388_s23 = sshll.u32 (!%p1926_p5), %s295_s16, 7  ;;  %s296_s20 = scalar_lea.sflag (!%p1926_p5), [#allocation3], %s295_s16 }
  0x29   : > { %s1997_s17 = scalar_lea.vmem (!%p1926_p5), [#allocation2], %s1388_s23 }
  0x2c   : > { %1817 = dma.done.wait (%p1919_p4), %s296_s20, 2048  }
  0x2d   : > { %1819 = vsyncadd (%p1919_p4), %s296_s20, 4294965248 }
  0x2e   : > { %1821 = dma.done.wait (%p1911_p1), [#allocation5], 4096  }
  0x2f   : > { %1823 = vsyncadd (%p1911_p1), [#allocation5], 4294963200 }
  0x30   : > { %1825 = dma.done.wait (%p1911_p1), [#allocation8], 2048  }
  0x31   : > { %1827 = vsyncadd (%p1911_p1), [#allocation8], 4294965248  ;;  %v384_v0 = vld [vmem:[#allocation4 + $0x78] sm:$0xff]  ;;  %v383_v1 = vld [vmem:[#allocation4 + $0x70] sm:$0xff]  ;;  %s2550_s18 = sadd.s32 4294967295, %s1842_s27  }
  0x32   : > { %389 = vmatpush.msra.mxu0 %v384_v0  ;;  %1429 = vmatpush.msra.mxu3 %v384_v0  ;;  %v382_v2 = vld [vmem:[#allocation4 + $0x68] sm:$0xff]  ;;  %v381_v3 = vld [vmem:[#allocation4 + $0x60] sm:$0xff]  ;;  %v380_v4 = vld [vmem:[#allocation4 + $0x58] sm:$0xff]  ;;  %s1392_s19 = sshll.u32 %s2550_s18, 4 }
  0x33   : > { %v379_v5 = vld [vmem:[#allocation4 + $0x50] sm:$0xff]  ;;  %v378_v6 = vld [vmem:[#allocation4 + $0x48] sm:$0xff]  ;;  %v377_v7 = vld [vmem:[#allocation4 + $0x40] sm:$0xff]  ;;  %p348_p1 = scmp.lt.s32.totalorder %s1392_s19, 31 }
  0x34   : > { %390 = vmatpush.msra.mxu0 %v383_v1  ;;  %1430 = vmatpush.msra.mxu3 %v383_v1  ;;  %v376_v8 = vld [vmem:[#allocation4 + $0x38] sm:$0xff]  ;;  %v375_v9 = vld [vmem:[#allocation4 + $0x30] sm:$0xff]  ;;  %v374_v10 = vld [vmem:[#allocation4 + $0x28] sm:$0xff] }
  0x35   : > { %v373_v11 = vld [vmem:[#allocation4 + $0x20] sm:$0xff]  ;;  %v372_v12 = vld [vmem:[#allocation4 + $0x18] sm:$0xff]  ;;  %v371_v13 = vld [vmem:[#allocation4 + $0x10] sm:$0xff]  ;;  %s2556_s19 = smov (!%p348_p1, %s1392_s19), 31 }
  0x36   : > { %391 = vmatpush.msra.mxu0 %v382_v2  ;;  %1431 = vmatpush.msra.mxu3 %v382_v2  ;;  %v370_v14 = vld [vmem:[#allocation4 + $0x8] sm:$0xff]  ;;  %v369_v15 = vld [vmem:[#allocation4] sm:$0xff]  ;;  %v355_v20 = vld [vmem:[%s1997_s17 + $0x10] sm:$0xff]  ;;  %s1393_s8 = sshll.u32 %s2556_s19, 3 }
  0x37   : > { %v353_v16 = vld [vmem:[%s1997_s17] sm:$0xff]  ;;  %v354_v18 = vld [vmem:[%s1997_s17 + $0x8] sm:$0xff]  ;;  %v367_v21 = vld [vmem:[%s1997_s17 + $0x70] sm:$0xff]  ;;  %s2457_s21 = scalar_lea.vmem %s2511_s7, %s1393_s8 }
  0x38   : > { %392 = vmatpush.msra.mxu0 %v381_v3  ;;  %1432 = vmatpush.msra.mxu3 %v381_v3  ;;  %v365_v17 = vld [vmem:[%s1997_s17 + $0x60] sm:$0xff]  ;;  %v366_v19 = vld [vmem:[%s1997_s17 + $0x68] sm:$0xff]  ;;  %v356_v22 = vld [vmem:[%s1997_s17 + $0x18] sm:$0xff] }
  0x39   : > { %v368_v23 = vld [vmem:[%s1997_s17 + $0x78] sm:$0xff]  ;;  %v357_v24 = vld [vmem:[%s1997_s17 + $0x20] sm:$0xff]  ;;  %v358_v25 = vld [vmem:[%s1997_s17 + $0x28] sm:$0xff] }
  0x3a   : > { %393 = vmatpush.msra.mxu0 %v380_v4  ;;  %1433 = vmatpush.msra.mxu3 %v380_v4  ;;  %v359_v26 = vld [vmem:[%s1997_s17 + $0x30] sm:$0xff]  ;;  %v360_v27 = vld [vmem:[%s1997_s17 + $0x38] sm:$0xff]  ;;  %v361_v28 = vld [vmem:[%s1997_s17 + $0x40] sm:$0xff] }
  0x3b   : > { %v362_v29 = vld [vmem:[%s1997_s17 + $0x48] sm:$0xff]  ;;  %v363_v30 = vld [vmem:[%s1997_s17 + $0x50] sm:$0xff]  ;;  %v364_v31 = vld [vmem:[%s1997_s17 + $0x58] sm:$0xff] }
  0x3c   : > { %394 = vmatpush.msra.mxu0 %v379_v5  ;;  %1434 = vmatpush.msra.mxu3 %v379_v5  ;;  %v789_v32 = vld [vmem:[#allocation6 + $0x78] sm:$0xff]  ;;  %v788_v33 = vld [vmem:[#allocation6 + $0x70] sm:$0xff]  ;;  %v787_v34 = vld [vmem:[#allocation6 + $0x68] sm:$0xff] }
  0x3d   : > { %794 = vmatpush.msra.mxu1 %v789_v32  ;;  %v786_v35 = vld [vmem:[#allocation6 + $0x60] sm:$0xff]  ;;  %v785_v36 = vld [vmem:[#allocation6 + $0x58] sm:$0xff]  ;;  %v784_v37 = vld [vmem:[#allocation6 + $0x50] sm:$0xff] }
  0x3e   : > { %395 = vmatpush.msra.mxu0 %v378_v6  ;;  %1435 = vmatpush.msra.mxu3 %v378_v6  ;;  %v783_v38 = vld [vmem:[#allocation6 + $0x48] sm:$0xff]  ;;  %v782_v39 = vld [vmem:[#allocation6 + $0x40] sm:$0xff]  ;;  %v781_v40 = vld [vmem:[#allocation6 + $0x38] sm:$0xff] }
  0x3f   : > { %795 = vmatpush.msra.mxu1 %v788_v33  ;;  %v780_v41 = vld [vmem:[#allocation6 + $0x30] sm:$0xff]  ;;  %v779_v42 = vld [vmem:[#allocation6 + $0x28] sm:$0xff]  ;;  %v778_v43 = vld [vmem:[#allocation6 + $0x20] sm:$0xff] }
  0x40   : > { %396 = vmatpush.msra.mxu0 %v377_v7  ;;  %1436 = vmatpush.msra.mxu3 %v377_v7  ;;  %v777_v44 = vld [vmem:[#allocation6 + $0x18] sm:$0xff]  ;;  %v776_v45 = vld [vmem:[#allocation6 + $0x10] sm:$0xff]  ;;  %v2030_v46 = vld [vmem:[%s2506_s2] ss:$0 sm:$0xff] }
  0x41   : > { %796 = vmatpush.msra.mxu1 %v787_v34  ;;  %v775_v47 = vld [vmem:[#allocation6 + $0x8] sm:$0xff]  ;;  %v774_v49 = vld [vmem:[#allocation6] sm:$0xff] }
  0x42   : > { %397 = vmatpush.msra.mxu0 %v376_v8  ;;  %1437 = vmatpush.msra.mxu3 %v376_v8 }
  0x43   : > { %797 = vmatpush.msra.mxu1 %v786_v35 }
  0x44   : > { %398 = vmatpush.msra.mxu0 %v375_v9  ;;  %1438 = vmatpush.msra.mxu3 %v375_v9 }
  0x45   : > { %798 = vmatpush.msra.mxu1 %v785_v36 }
  0x46   : > { %399 = vmatpush.msra.mxu0 %v374_v10  ;;  %1439 = vmatpush.msra.mxu3 %v374_v10 }
  0x47   : > { %799 = vmatpush.msra.mxu1 %v784_v37 }
  0x48   : > { %400 = vmatpush.msra.mxu0 %v373_v11  ;;  %1440 = vmatpush.msra.mxu3 %v373_v11 }
  0x49   : > { %800 = vmatpush.msra.mxu1 %v783_v38 }
  0x4a   : > { %401 = vmatpush.msra.mxu0 %v372_v12  ;;  %1441 = vmatpush.msra.mxu3 %v372_v12 }
  0x4b   : > { %801 = vmatpush.msra.mxu1 %v782_v39 }
  0x4c   : > { %402 = vmatpush.msra.mxu0 %v371_v13  ;;  %1442 = vmatpush.msra.mxu3 %v371_v13 }
  0x4d   : > { %802 = vmatpush.msra.mxu1 %v781_v40 }
  0x4e   : > { %403 = vmatpush.msra.mxu0 %v370_v14  ;;  %1443 = vmatpush.msra.mxu3 %v370_v14 }
  0x4f   : > { %803 = vmatpush.msra.mxu1 %v780_v41 }
  0x50   : > { %404 = vmatpush.msra.mxu0 %v369_v15  ;;  %1444 = vmatpush.msra.mxu3 %v369_v15 }
  0x51   : > { %405 = vmatmul.f32.vlgmr.msra.gmra.mxu0 %v353_v16  ;;  %441 = vmatmul.f32.vlgmr.msra.gmra.mxu3 %v365_v17 }
  0x52   : > { %1445 = vmatpush.msrb.mxu3 %v789_v32  ;;  %804 = vmatpush.msra.mxu1 %v779_v42 }
  0x54   : > { %1446 = vmatpush.msrb.mxu3 %v788_v33  ;;  %805 = vmatpush.msra.mxu1 %v778_v43 }
  0x56   : > { %1447 = vmatpush.msrb.mxu3 %v787_v34  ;;  %806 = vmatpush.msra.mxu1 %v777_v44 }
  0x58   : > { %1448 = vmatpush.msrb.mxu3 %v786_v35  ;;  %807 = vmatpush.msra.mxu1 %v776_v45 }
  0x59   : > { %408 = vmatmul.f32.gmra.mxu0 %v354_v18  ;;  %444 = vmatmul.f32.gmra.mxu3 %v366_v19 }
  0x5a   : > { %1449 = vmatpush.msrb.mxu3 %v785_v36  ;;  %808 = vmatpush.msra.mxu1 %v775_v47 }
  0x5c   : > { %1450 = vmatpush.msrb.mxu3 %v784_v37  ;;  %809 = vmatpush.msra.mxu1 %v774_v49 }
  0x5e   : > { %1451 = vmatpush.msrb.mxu3 %v783_v38 }
  0x60   : > { %1452 = vmatpush.msrb.mxu3 %v782_v39 }
  0x61   : > { %411 = vmatmul.f32.gmra.mxu0 %v355_v20  ;;  %447 = vmatmul.f32.gmra.mxu3 %v367_v21 }
  0x62   : > { %1453 = vmatpush.msrb.mxu3 %v781_v40 }
  0x64   : > { %1454 = vmatpush.msrb.mxu3 %v780_v41 }
  0x66   : > { %1455 = vmatpush.msrb.mxu3 %v779_v42 }
  0x68   : > { %1456 = vmatpush.msrb.mxu3 %v778_v43 }
  0x69   : > { %414 = vmatmul.f32.gmra.mxu0 %v356_v22  ;;  %450 = vmatmul.f32.gmra.mxu3 %v368_v23 }
  0x6a   : > { %1457 = vmatpush.msrb.mxu3 %v777_v44 }
  0x6c   : > { %1458 = vmatpush.msrb.mxu3 %v776_v45 }
  0x6e   : > { %1459 = vmatpush.msrb.mxu3 %v775_v47 }
  0x70   : > { %1460 = vmatpush.msrb.mxu3 %v774_v49 }
  0x71   : > { %417 = vmatmul.f32.gmra.mxu0 %v357_v24 }
  0x79   : > { %420 = vmatmul.f32.gmra.mxu0 %v358_v25 }
  0x81   : > { %423 = vmatmul.f32.gmra.mxu0 %v359_v26 }
  0x89   : > { %426 = vmatmul.f32.gmra.mxu0 %v360_v27 }
  0x91   : > { %429 = vmatmul.f32.gmra.mxu0 %v361_v28 }
  0x99   : > { %432 = vmatmul.f32.gmra.mxu0 %v362_v29 }
  0xa1   : > { %435 = vmatmul.f32.gmra.mxu0 %v363_v30 }
  0xa9   : > { %438 = vmatmul.f32.gmra.mxu0 %v364_v31 }
  0xce   : > { %v406_v48 = vpop.f32.mrf.mxu0 }
  0xcf   : > { %v2033_v50 = vadd.f32 %v2030_v46, %v406_v48 }
  0xd1   : > { %v1394_v51 = vmul.f32 -1.442695, %v2033_v50 }
  0xd3   : > { %1552 = vpow2.f32 %v1394_v51 }
  0xd4   : > { %v442_v52 = vpop.f32.mrf.mxu3 }
  0xd5   : > { %v2037_v53 = vadd.f32 %v2030_v46, %v442_v52 }
  0xd6   : > { %v409_v54 = vpop.f32.mrf.mxu0 }
  0xd7   : > { %v1406_v55 = vmul.f32 -1.442695, %v2037_v53  ;;  %v2041_v56 = vadd.f32 %v2030_v46, %v409_v54 }
  0xd9   : > { %v1553_v57 = vpop.eup %1552  ;;  %1554 = vpow2.f32 %v1406_v55  ;;  %v1395_v58 = vmul.f32 -1.442695, %v2041_v56 }
  0xda   : > { %v502_v59 = vadd.f32 1.0, %v1553_v57 }
  0xdb   : > { %1556 = vpow2.f32 %v1395_v58 }
  0xdc   : > { %1558 = vrcp.f32 %v502_v59  ;;  %v445_v60 = vpop.f32.mrf.mxu3  ;;  %v527_v6 = vand.u32 2147483647, %v502_v59  ;;  %v529_v9 = vand.u32 2147483648, %v502_v59  ;;  %vm523_vm0 = vweird.f32 %v502_v59 }
  0xdd   : > { %v2045_v61 = vadd.f32 %v2030_v46, %v445_v60 }
  0xde   : > { %v412_v62 = vpop.f32.mrf.mxu0  ;;  %vm2058_vm1 = vcmp.eq.f32.partialorder %v527_v6, 8.507059e+37  ;;  %v530_v21 = vor.u32 1.1754944e-38, %v529_v9 }
  0xdf   : > { %v1555_v63 = vpop.eup %1554  ;;  %v1407_v0 = vmul.f32 -1.442695, %v2045_v61  ;;  %v2049_v1 = vadd.f32 %v2030_v46, %v412_v62 }
  0xe0   : > { %v514_v2 = vadd.f32 1.0, %v1555_v63 }
  0xe1   : > { %v1557_v3 = vpop.eup %1556  ;;  %1560 = vpow2.f32 %v1407_v0  ;;  %v1396_v4 = vmul.f32 -1.442695, %v2049_v1 }
  0xe2   : > { %v1559_v5 = vpop.eup %1558  ;;  %1562 = vrcp.f32 %v514_v2  ;;  %v2052_v7 = vadd.f32 1.0, %v1557_v3  ;;  %v707_v10 = vand.u32 2147483647, %v514_v2  ;;  %v709_v14 = vand.u32 2147483648, %v514_v2 }
  0xe3   : > { %1564 = vpow2.f32 %v1396_v4  ;;  %v519_v8 = vmul.f32 %v1559_v5, %v502_v59  ;;  %vm703_vm2 = vweird.f32 %v514_v2  ;;  %vm524_vm4 = vweird.f32 %v1559_v5 }
  0xe4   : > { %v448_v11 = vpop.f32.mrf.mxu3  ;;  %1566 = vrcp.f32 %v2052_v7  ;;  %vm2066_vm3 = vcmp.eq.f32.partialorder %v707_v10, 8.507059e+37  ;;  %v544_v28 = vand.u32 2147483648, %v2052_v7  ;;  %v710_v29 = vor.u32 1.1754944e-38, %v709_v14  ;;  %vm525_vm6 = vmor %vm523_vm0, %vm524_vm4 }
  0xe5   : > { %v2056_v12 = vadd.f32 %v2030_v46, %v448_v11  ;;  %v520_v13 = vsub.f32 1.0, %v519_v8  ;;  %vm538_vm7 = vweird.f32 %v2052_v7  ;;  %v542_v37 = vand.u32 2147483647, %v2052_v7 }
  0xe6   : > { %v415_v15 = vpop.f32.mrf.mxu0  ;;  %v545_v41 = vor.u32 1.1754944e-38, %v544_v28 }
  0xe7   : > { %v1561_v17 = vpop.eup %1560  ;;  %v1408_v18 = vmul.f32 -1.442695, %v2056_v12  ;;  %v2064_v19 = vadd.f32 %v2030_v46, %v415_v15  ;;  %v521_v20 = vmul.f32 %v1559_v5, %v520_v13  ;;  %vm543_vm13 = vcmp.eq.f32.partialorder %v542_v37, 8.507059e+37 }
  0xe8   : > { %v1563_v22 = vpop.eup %1562  ;;  %v2070_v24 = vadd.f32 1.0, %v1561_v17 }
  0xe9   : > { %v1565_v25 = vpop.eup %1564  ;;  %v699_v26 = vmul.f32 %v1563_v22, %v514_v2  ;;  %1568 = vpow2.f32 %v1408_v18  ;;  %v1397_v27 = vmul.f32 -1.442695, %v2064_v19  ;;  %v522_v31 = vadd.f32 %v1559_v5, %v521_v20 }
  0xea   : > { %1570 = vrcp.f32 %v2070_v24  ;;  %v2075_v30 = vadd.f32 1.0, %v1565_v25  ;;  %v1567_v32 = vpop.eup %1566  ;;  %vm704_vm5 = vweird.f32 %v1563_v22  ;;  %vm718_vm9 = vweird.f32 %v2070_v24 }
  0xeb   : > { %v700_v33 = vsub.f32 1.0, %v699_v26  ;;  %1572 = vpow2.f32 %v1397_v27  ;;  %v526_v35 = vsel %vm525_vm6, %v1559_v5, %v522_v31  ;;  %v534_v36 = vmul.f32 %v1567_v32, %v2052_v7  ;;  %vm2088_vm8 = vmor %vm703_vm2, %vm704_vm5 }
  0xec   : > { %1574 = vrcp.f32 %v2075_v30  ;;  %v451_v34 = vpop.f32.mrf.mxu3  ;;  %v531_v40 = vsel %vm2058_vm1, %v530_v21, %v526_v35  ;;  %v722_v47 = vand.u32 2147483647, %v2070_v24  ;;  %v724_v54 = vand.u32 2147483648, %v2070_v24 }
  0xed   : > { %v701_v38 = vmul.f32 %v1563_v22, %v700_v33  ;;  %v2083_v39 = vadd.f32 %v2030_v46, %v451_v34  ;;  %v758_v44 = vmul.f32 %v531_v40, %v2033_v50  ;;  %v535_v45 = vsub.f32 1.0, %v534_v36 }
  0xee   : > { %v418_v43 = vpop.f32.mrf.mxu0  ;;  %vm539_vm10 = vweird.f32 %v1567_v32  ;;  %v559_v50 = vand.u32 2147483648, %v2075_v30  ;;  %vm2117_vm14 = vcmp.eq.f32.partialorder %v722_v47, 8.507059e+37  ;;  %vm553_vm0 = vweird.f32 %v2075_v30 }
  0xef   : > { %v1569_v48 = vpop.eup %1568  ;;  %v702_v49 = vadd.f32 %v1563_v22, %v701_v38  ;;  %v1409_v51 = vmul.f32 -1.442695, %v2083_v39  ;;  %v2097_v52 = vadd.f32 %v2030_v46, %v418_v43  ;;  %810 = vmatmul.f32.vlgmr.msra.gmra.mxu1 %v758_v44  ;;  %v536_v58 = vmul.f32 %v1567_v32, %v535_v45  ;;  %vm540_vm11 = vmor %vm538_vm7, %vm539_vm10 }
  0xf0   : > { %v1571_v55 = vpop.eup %1570  ;;  %v2100_v57 = vadd.f32 1.0, %v1569_v48  ;;  %v557_v17 = vand.u32 2147483647, %v2075_v30 }
  0xf1   : > { %v1573_v59 = vpop.eup %1572  ;;  %v706_v60 = vsel %vm2088_vm8, %v1563_v22, %v702_v49  ;;  %1576 = vpow2.f32 %v1409_v51  ;;  %v1398_v62 = vmul.f32 -1.442695, %v2097_v52  ;;  %v714_v63 = vmul.f32 %v1571_v55, %v2070_v24 }
  0xf2   : > { %v1575_v0 = vpop.eup %1574  ;;  %v711_v2 = vsel %vm2066_vm3, %v710_v29, %v706_v60  ;;  %1578 = vrcp.f32 %v2100_v57  ;;  %v2110_v3 = vadd.f32 1.0, %v1573_v59  ;;  %v537_v4 = vadd.f32 %v1567_v32, %v536_v58 }
  0xf3   : > { %v770_v5 = vmul.f32 %v711_v2, %v2037_v53  ;;  %1580 = vpow2.f32 %v1398_v62  ;;  %v715_v6 = vsub.f32 1.0, %v714_v63  ;;  %vm719_vm12 = vweird.f32 %v1571_v55 }
  0xf4   : > { %1582 = vrcp.f32 %v2110_v3  ;;  %v541_v8 = vsel %vm540_vm11, %v1567_v32, %v537_v4  ;;  %v549_v9 = vmul.f32 %v1575_v0, %v2075_v30  ;;  %v725_v53 = vor.u32 1.1754944e-38, %v724_v54  ;;  %vm2124_vm15 = vmor %vm718_vm9, %vm719_vm12 }
  0xf5   : > { %846 = vmatmul.f32.vlgmr.msrb.gmra.mxu3 %v770_v5  ;;  %v546_v10 = vsel %vm543_vm13, %v545_v41, %v541_v8  ;;  %v716_v11 = vmul.f32 %v1571_v55, %v715_v6  ;;  %vm554_vm1 = vweird.f32 %v1575_v0  ;;  %v560_v22 = vor.u32 1.1754944e-38, %v559_v50 }
  0xf6   : > { %v421_v14 = vpop.f32.mrf.mxu0  ;;  %v759_v7 = vmul.f32 %v546_v10, %v2041_v56  ;;  %v550_v16 = vsub.f32 1.0, %v549_v9  ;;  %vm733_vm2 = vweird.f32 %v2100_v57  ;;  %v737_v25 = vand.u32 2147483647, %v2100_v57  ;;  %vm555_vm3 = vmor %vm553_vm0, %vm554_vm1 }
  0xf7   : > { %v1577_v18 = vpop.eup %1576  ;;  %v2131_v20 = vadd.f32 %v2030_v46, %v421_v14  ;;  %v717_v21 = vadd.f32 %v1571_v55, %v716_v11  ;;  %v739_v31 = vand.u32 2147483648, %v2100_v57  ;;  %vm558_vm5 = vcmp.eq.f32.partialorder %v557_v17, 8.507059e+37 }
  0xf8   : > { %v1579_v23 = vpop.eup %1578  ;;  %v2133_v56 = vadd.f32 1.0, %v1577_v18  ;;  %813 = vmatmul.f32.gmra.mxu1 %v759_v7  ;;  %v551_v24 = vmul.f32 %v1575_v0, %v550_v16  ;;  %vm568_vm6 = vweird.f32 %v2110_v3  ;;  %v574_v43 = vand.u32 2147483648, %v2110_v3 }
  0xf9   : > { %v1581_v26 = vpop.eup %1580  ;;  %v1399_v27 = vmul.f32 -1.442695, %v2131_v20  ;;  %v721_v28 = vsel %vm2124_vm15, %v1571_v55, %v717_v21  ;;  %v729_v29 = vmul.f32 %v1579_v23, %v2100_v57  ;;  %vm734_vm4 = vweird.f32 %v1579_v23 }
  0xfa   : > { %v1583_v32 = vpop.eup %1582  ;;  %1584 = vrcp.f32 %v2133_v56  ;;  %v2143_v33 = vadd.f32 1.0, %v1581_v26  ;;  %v726_v34 = vsel %vm2117_vm14, %v725_v53, %v721_v28  ;;  %v552_v35 = vadd.f32 %v1575_v0, %v551_v24  ;;  %vm2158_vm7 = vmor %vm733_vm2, %vm734_vm4 }
  0xfb   : > { %1586 = vpow2.f32 %v1399_v27  ;;  %v771_v36 = vmul.f32 %v726_v34, %v2045_v61  ;;  %v730_v37 = vsub.f32 1.0, %v729_v29  ;;  %v564_v40 = vmul.f32 %v1583_v32, %v2110_v3 }
  0xfc   : > { %1588 = vrcp.f32 %v2143_v33  ;;  %v556_v38 = vsel %vm555_vm3, %v1575_v0, %v552_v35  ;;  %vm2162_vm8 = vcmp.eq.f32.partialorder %v737_v25, 8.507059e+37  ;;  %v740_v47 = vor.u32 1.1754944e-38, %v739_v31 }
  0xfd   : > { %849 = vmatmul.f32.gmra.mxu3 %v771_v36  ;;  %v561_v41 = vsel %vm558_vm5, %v560_v22, %v556_v38  ;;  %v731_v42 = vmul.f32 %v1579_v23, %v730_v37  ;;  %v565_v48 = vsub.f32 1.0, %v564_v40  ;;  %vm569_vm9 = vweird.f32 %v1583_v32 }
  0xfe   : > { %v424_v61 = vpop.f32.mrf.mxu0  ;;  %v760_v44 = vmul.f32 %v561_v41, %v2049_v1  ;;  %v572_v54 = vand.u32 2147483647, %v2110_v3  ;;  %v575_v57 = vor.u32 1.1754944e-38, %v574_v43  ;;  %vm748_vm10 = vweird.f32 %v2133_v56  ;;  %vm570_vm12 = vmor %vm568_vm6, %vm569_vm9 }
  0xff   : > { %v2167_v49 = vadd.f32 %v2030_v46, %v424_v61  ;;  %v732_v51 = vadd.f32 %v1579_v23, %v731_v42  ;;  %v566_v55 = vmul.f32 %v1583_v32, %v565_v48  ;;  %v752_v58 = vand.u32 2147483647, %v2133_v56 }
 0x100   : > { %v1585_v1 = vpop.eup %1584  ;;  %816 = vmatmul.f32.gmra.mxu1 %v760_v44  ;;  %v754_v63 = vand.u32 2147483648, %v2133_v56  ;;  %vm573_vm13 = vcmp.eq.f32.partialorder %v572_v54, 8.507059e+37  ;;  %v587_v16 = vand.u32 2147483647, %v2143_v33  ;;  %v589_v17 = vand.u32 2147483648, %v2143_v33 }
 0x101   : > { %v1587_v50 = vpop.eup %1586  ;;  %v1400_v59 = vmul.f32 -1.442695, %v2167_v49  ;;  %v736_v60 = vsel %vm2158_vm7, %v1579_v23, %v732_v51  ;;  %v744_v62 = vmul.f32 %v1585_v1, %v2133_v56  ;;  %v567_v5 = vadd.f32 %v1583_v32, %v566_v55 }
 0x102   : > { %v1589_v0 = vpop.eup %1588  ;;  %v2177_v2 = vadd.f32 1.0, %v1587_v50  ;;  %v741_v4 = vsel %vm2162_vm8, %v740_v47, %v736_v60  ;;  %vm749_vm11 = vweird.f32 %v1585_v1  ;;  %vm2187_vm14 = vcmp.eq.f32.partialorder %v752_v58, 8.507059e+37 }
 0x103   : > { %1590 = vpow2.f32 %v1400_v59  ;;  %v772_v6 = vmul.f32 %v741_v4, %v2056_v12  ;;  %v745_v8 = vsub.f32 1.0, %v744_v62  ;;  %v579_v9 = vmul.f32 %v1589_v0, %v2143_v33  ;;  %vm2195_vm15 = vmor %vm748_vm10, %vm749_vm11 }
 0x104   : > { %1592 = vrcp.f32 %v2177_v2  ;;  %v571_v10 = vsel %vm570_vm12, %v1583_v32, %v567_v5  ;;  %v755_v15 = vor.u32 1.1754944e-38, %v754_v63  ;;  %vm584_vm0 = vweird.f32 %v1589_v0 }
 0x105   : > { %852 = vmatmul.f32.gmra.mxu3 %v772_v6  ;;  %v576_v11 = vsel %vm573_vm13, %v575_v57, %v571_v10  ;;  %v746_v13 = vmul.f32 %v1585_v1, %v745_v8  ;;  %v580_v14 = vsub.f32 1.0, %v579_v9  ;;  %vm583_vm1 = vweird.f32 %v2143_v33 }
 0x106   : > { %v427_v12 = vpop.f32.mrf.mxu0  ;;  %v761_v7 = vmul.f32 %v576_v11, %v2064_v19  ;;  %vm585_vm2 = vmor %vm583_vm1, %vm584_vm0  ;;  %vm588_vm3 = vcmp.eq.f32.partialorder %v587_v16, 8.507059e+37  ;;  %v590_v28 = vor.u32 1.1754944e-38, %v589_v17  ;;  %v604_v37 = vand.u32 2147483648, %v2177_v2 }
 0x107   : > { %v2202_v18 = vadd.f32 %v2030_v46, %v427_v12  ;;  %v747_v21 = vadd.f32 %v1585_v1, %v746_v13  ;;  %v581_v22 = vmul.f32 %v1589_v0, %v580_v14  ;;  %v602_v41 = vand.u32 2147483647, %v2177_v2 }
 0x108   : > { %819 = vmatmul.f32.gmra.mxu1 %v761_v7  ;;  %vm598_vm5 = vweird.f32 %v2177_v2  ;;  %v605_v44 = vor.u32 1.1754944e-38, %v604_v37 }
 0x109   : > { %v1591_v19 = vpop.eup %1590  ;;  %v1401_v23 = vmul.f32 -1.442695, %v2202_v18  ;;  %v751_v56 = vsel %vm2195_vm15, %v1585_v1, %v747_v21  ;;  %v582_v24 = vadd.f32 %v1589_v0, %v581_v22  ;;  %vm603_vm7 = vcmp.eq.f32.partialorder %v602_v41, 8.507059e+37 }
 0x10a   : > { %v1593_v25 = vpop.eup %1592  ;;  %v508_v26 = vadd.f32 1.0, %v1591_v19  ;;  %v756_v27 = vsel %vm2187_vm14, %v755_v15, %v751_v56 }
 0x10b   : > { %1594 = vpow2.f32 %v1401_v23  ;;  %v773_v29 = vmul.f32 %v756_v27, %v2083_v39  ;;  %v586_v31 = vsel %vm585_vm2, %v1589_v0, %v582_v24  ;;  %v594_v32 = vmul.f32 %v1593_v25, %v2177_v2 }
 0x10c   : > { %1596 = vrcp.f32 %v508_v26  ;;  %v591_v34 = vsel %vm588_vm3, %v590_v28, %v586_v31  ;;  %vm599_vm4 = vweird.f32 %v1593_v25  ;;  %v619_v1 = vand.u32 2147483648, %v508_v26 }
 0x10d   : > { %855 = vmatmul.f32.gmra.mxu3 %v773_v29  ;;  %v762_v35 = vmul.f32 %v591_v34, %v2097_v52  ;;  %v595_v33 = vsub.f32 1.0, %v594_v32  ;;  %vm600_vm6 = vmor %vm598_vm5, %vm599_vm4  ;;  %v617_v58 = vand.u32 2147483647, %v508_v26  ;;  %vm613_vm9 = vweird.f32 %v508_v26 }
 0x10e   : > { %v430_v36 = vpop.f32.mrf.mxu0  ;;  %v620_v0 = vor.u32 1.1754944e-38, %v619_v1 }
 0x10f   : > { %v2215_v38 = vadd.f32 %v2030_v46, %v430_v36  ;;  %v596_v40 = vmul.f32 %v1593_v25, %v595_v33  ;;  %vm618_vm11 = vcmp.eq.f32.partialorder %v617_v58, 8.507059e+37 }
 0x110   : > { %822 = vmatmul.f32.gmra.mxu1 %v762_v35 }
 0x111   : > { %v1595_v39 = vpop.eup %1594  ;;  %v1402_v42 = vmul.f32 -1.442695, %v2215_v38  ;;  %v597_v43 = vadd.f32 %v1593_v25, %v596_v40 }
 0x112   : > { %v1597_v61 = vpop.eup %1596  ;;  %v509_v52 = vadd.f32 1.0, %v1595_v39 }
 0x113   : > { %1598 = vpow2.f32 %v1402_v42  ;;  %v601_v30 = vsel %vm600_vm6, %v1593_v25, %v597_v43  ;;  %v609_v45 = vmul.f32 %v1597_v61, %v508_v26  ;;  %vm614_vm8 = vweird.f32 %v1597_v61 }
 0x114   : > { %1600 = vrcp.f32 %v509_v52  ;;  %v606_v47 = vsel %vm603_vm7, %v605_v44, %v601_v30  ;;  %vm615_vm10 = vmor %vm613_vm9, %vm614_vm8  ;;  %v634_v9 = vand.u32 2147483648, %v509_v52  ;;  %v632_v13 = vand.u32 2147483647, %v509_v52 }
 0x115   : > { %v763_v48 = vmul.f32 %v606_v47, %v2131_v20  ;;  %v610_v51 = vsub.f32 1.0, %v609_v45  ;;  %vm628_vm13 = vweird.f32 %v509_v52 }
 0x116   : > { %v433_v54 = vpop.f32.mrf.mxu0  ;;  %v635_v15 = vor.u32 1.1754944e-38, %v634_v9  ;;  %vm633_vm15 = vcmp.eq.f32.partialorder %v632_v13, 8.507059e+37  ;;  %v1193_v9 = vld [vmem:[#allocation7 + $0x70] sm:$0xff]  ;;  %v1190_v13 = vld [vmem:[#allocation7 + $0x58] sm:$0xff] }
 0x117   : > { %v2222_v55 = vadd.f32 %v2030_v46, %v433_v54  ;;  %v611_v57 = vmul.f32 %v1597_v61, %v610_v51 }
 0x118   : > { %825 = vmatmul.f32.gmra.mxu1 %v763_v48 }
 0x119   : > { %v1599_v50 = vpop.eup %1598  ;;  %v1403_v59 = vmul.f32 -1.442695, %v2222_v55  ;;  %v612_v60 = vadd.f32 %v1597_v61, %v611_v57 }
 0x11a   : > { %v1601_v62 = vpop.eup %1600  ;;  %v510_v63 = vadd.f32 1.0, %v1599_v50 }
 0x11b   : > { %1602 = vpow2.f32 %v1403_v59  ;;  %v616_v20 = vsel %vm615_vm10, %v1597_v61, %v612_v60  ;;  %v624_v2 = vmul.f32 %v1601_v62, %v509_v52  ;;  %vm629_vm12 = vweird.f32 %v1601_v62 }
 0x11c   : > { %1604 = vrcp.f32 %v510_v63  ;;  %v621_v4 = vsel %vm618_vm11, %v620_v0, %v616_v20  ;;  %vm630_vm14 = vmor %vm628_vm13, %vm629_vm12  ;;  %v649_v23 = vand.u32 2147483648, %v510_v63  ;;  %v647_v25 = vand.u32 2147483647, %v510_v63 }
 0x11d   : > { %v764_v5 = vmul.f32 %v621_v4, %v2167_v49  ;;  %v625_v6 = vsub.f32 1.0, %v624_v2  ;;  %vm643_vm1 = vweird.f32 %v510_v63 }
 0x11e   : > { %v436_v8 = vpop.f32.mrf.mxu0  ;;  %v650_v32 = vor.u32 1.1754944e-38, %v649_v23  ;;  %vm648_vm3 = vcmp.eq.f32.partialorder %v647_v25, 8.507059e+37  ;;  %v1181_v23 = vld [vmem:[#allocation7 + $0x10] sm:$0xff] }
 0x11f   : > { %v2227_v10 = vadd.f32 %v2030_v46, %v436_v8  ;;  %v626_v11 = vmul.f32 %v1601_v62, %v625_v6  ;;  %v1194_v8 = vld [vmem:[#allocation7 + $0x78] sm:$0xff] }
 0x120   : > { %828 = vmatmul.f32.gmra.mxu1 %v764_v5  ;;  %1199 = vmatpush.msra.mxu2 %v1194_v8 }
 0x121   : > { %v1603_v53 = vpop.eup %1602  ;;  %v1404_v14 = vmul.f32 -1.442695, %v2227_v10  ;;  %v627_v12 = vadd.f32 %v1601_v62, %v626_v11  ;;  %1461 = vmatpush.msra.mxu3 %v1194_v8  ;;  %v1191_v11 = vld [vmem:[#allocation7 + $0x60] sm:$0xff] }
 0x122   : > { %v1605_v7 = vpop.eup %1604  ;;  %v511_v3 = vadd.f32 1.0, %v1603_v53  ;;  %1200 = vmatpush.msra.mxu2 %v1193_v9  ;;  %v1189_v53 = vld [vmem:[#allocation7 + $0x50] sm:$0xff] }
 0x123   : > { %1606 = vpow2.f32 %v1404_v14  ;;  %v631_v49 = vsel %vm630_vm14, %v1601_v62, %v627_v12  ;;  %v639_v16 = vmul.f32 %v1605_v7, %v510_v63  ;;  %vm644_vm0 = vweird.f32 %v1605_v7  ;;  %1462 = vmatpush.msra.mxu3 %v1193_v9  ;;  %v1188_v14 = vld [vmem:[#allocation7 + $0x48] sm:$0xff]  ;;  %v1187_v12 = vld [vmem:[#allocation7 + $0x40] sm:$0xff] }
 0x124   : > { %1608 = vrcp.f32 %v511_v3  ;;  %v636_v17 = vsel %vm633_vm15, %v635_v15, %v631_v49  ;;  %vm645_vm2 = vmor %vm643_vm1, %vm644_vm0  ;;  %v664_v36 = vand.u32 2147483648, %v511_v3  ;;  %v662_v40 = vand.u32 2147483647, %v511_v3  ;;  %v2242_v15 = vld [vmem:[%s2508_s4] ss:$0 sm:$0xff]  ;;  %v1184_v49 = vld [vmem:[#allocation7 + $0x28] sm:$0xff] }
 0x125   : > { %v765_v21 = vmul.f32 %v636_v17, %v2202_v18  ;;  %v640_v22 = vsub.f32 1.0, %v639_v16  ;;  %vm658_vm5 = vweird.f32 %v511_v3  ;;  %v1183_v16 = vld [vmem:[#allocation7 + $0x20] sm:$0xff] }
 0x126   : > { %v439_v19 = vpop.f32.mrf.mxu0  ;;  %v665_v61 = vor.u32 1.1754944e-38, %v664_v36  ;;  %vm663_vm7 = vcmp.eq.f32.partialorder %v662_v40, 8.507059e+37 }
 0x127   : > { %v2232_v56 = vadd.f32 %v2030_v46, %v439_v19  ;;  %v641_v24 = vmul.f32 %v1605_v7, %v640_v22  ;;  %v1182_v22 = vld [vmem:[#allocation7 + $0x18] sm:$0xff] }
 0x128   : > { %831 = vmatmul.f32.gmra.mxu1 %v765_v21 }
 0x129   : > { %v1607_v26 = vpop.eup %1606  ;;  %v1405_v27 = vmul.f32 -1.442695, %v2232_v56  ;;  %v642_v28 = vadd.f32 %v1605_v7, %v641_v24  ;;  %v1179_v24 = vld [vmem:[#allocation7] sm:$0xff] }
 0x12a   : > { %v1609_v29 = vpop.eup %1608  ;;  %v512_v31 = vadd.f32 1.0, %v1607_v26 }
 0x12b   : > { %1610 = vpow2.f32 %v1405_v27  ;;  %v646_v18 = vsel %vm645_vm2, %v1605_v7, %v642_v28  ;;  %v654_v34 = vmul.f32 %v1609_v29, %v511_v3  ;;  %vm659_vm4 = vweird.f32 %v1609_v29  ;;  %v1186_v7 = vld [vmem:[#allocation7 + $0x38] sm:$0xff]  ;;  %v1185_v3 = vld [vmem:[#allocation7 + $0x30] sm:$0xff] }
 0x12c   : > { %1612 = vrcp.f32 %v512_v31  ;;  %v651_v46 = vsel %vm648_vm3, %v650_v32, %v646_v18  ;;  %vm660_vm6 = vmor %vm658_vm5, %vm659_vm4  ;;  %v679_v47 = vand.u32 2147483648, %v512_v31  ;;  %v677_v51 = vand.u32 2147483647, %v512_v31 }
 0x12d   : > { %v766_v35 = vmul.f32 %v651_v46, %v2215_v38  ;;  %v655_v33 = vsub.f32 1.0, %v654_v34  ;;  %vm673_vm9 = vweird.f32 %v512_v31 }
 0x12e   : > { %v680_v57 = vor.u32 1.1754944e-38, %v679_v47  ;;  %vm678_vm11 = vcmp.eq.f32.partialorder %v677_v51, 8.507059e+37 }
 0x12f   : > { %v656_v37 = vmul.f32 %v1609_v29, %v655_v33 }
 0x130   : > { %834 = vmatmul.f32.gmra.mxu1 %v766_v35 }
 0x131   : > { %v1611_v41 = vpop.eup %1610  ;;  %v657_v39 = vadd.f32 %v1609_v29, %v656_v37 }
 0x132   : > { %v1613_v42 = vpop.eup %1612  ;;  %v513_v43 = vadd.f32 1.0, %v1611_v41 }
 0x133   : > { %v661_v52 = vsel %vm660_vm6, %v1609_v29, %v657_v39  ;;  %v669_v44 = vmul.f32 %v1613_v42, %v512_v31  ;;  %vm674_vm8 = vweird.f32 %v1613_v42 }
 0x134   : > { %1614 = vrcp.f32 %v513_v43  ;;  %v666_v30 = vsel %vm663_vm7, %v665_v61, %v661_v52  ;;  %vm675_vm10 = vmor %vm673_vm9, %vm674_vm8  ;;  %v694_v63 = vand.u32 2147483648, %v513_v43  ;;  %v692_v0 = vand.u32 2147483647, %v513_v43 }
 0x135   : > { %v767_v38 = vmul.f32 %v666_v30, %v2222_v55  ;;  %v670_v45 = vsub.f32 1.0, %v669_v44  ;;  %vm688_vm13 = vweird.f32 %v513_v43 }
 0x136   : > { %v695_v2 = vor.u32 1.1754944e-38, %v694_v63  ;;  %vm693_vm15 = vcmp.eq.f32.partialorder %v692_v0, 8.507059e+37 }
 0x137   : > { %v671_v48 = vmul.f32 %v1613_v42, %v670_v45 }
 0x138   : > { %837 = vmatmul.f32.gmra.mxu1 %v767_v38 }
 0x139   : > { %v672_v54 = vadd.f32 %v1613_v42, %v671_v48 }
 0x13a   : > { %v1615_v1 = vpop.eup %1614 }
 0x13b   : > { %v676_v58 = vsel %vm675_vm10, %v1613_v42, %v672_v54  ;;  %v684_v50 = vmul.f32 %v1615_v1, %v513_v43  ;;  %vm689_vm12 = vweird.f32 %v1615_v1 }
 0x13c   : > { %v681_v59 = vsel %vm678_vm11, %v680_v57, %v676_v58  ;;  %vm690_vm14 = vmor %vm688_vm13, %vm689_vm12 }
 0x13d   : > { %v768_v60 = vmul.f32 %v681_v59, %v2227_v10  ;;  %v685_v62 = vsub.f32 1.0, %v684_v50  ;;  %v1192_v10 = vld [vmem:[#allocation7 + $0x68] sm:$0xff] }
 0x13e   : > { %1201 = vmatpush.msra.mxu2 %v1192_v10  ;;  %1463 = vmatpush.msra.mxu3 %v1192_v10 }
 0x13f   : > { %v686_v55 = vmul.f32 %v1615_v1, %v685_v62 }
 0x140   : > { %840 = vmatmul.f32.gmra.mxu1 %v768_v60  ;;  %1202 = vmatpush.msra.mxu2 %v1191_v11 }
 0x141   : > { %v687_v20 = vadd.f32 %v1615_v1, %v686_v55  ;;  %1464 = vmatpush.msra.mxu3 %v1191_v11 }
 0x142   : > { %1203 = vmatpush.msra.mxu2 %v1190_v13 }
 0x143   : > { %v691_v4 = vsel %vm690_vm14, %v1615_v1, %v687_v20  ;;  %1465 = vmatpush.msra.mxu3 %v1190_v13 }
 0x144   : > { %v696_v5 = vsel %vm693_vm15, %v695_v2, %v691_v4  ;;  %1204 = vmatpush.msra.mxu2 %v1189_v53 }
 0x145   : > { %v769_v6 = vmul.f32 %v696_v5, %v2232_v56  ;;  %1466 = vmatpush.msra.mxu3 %v1189_v53  ;;  %v1180_v56 = vld [vmem:[#allocation7 + $0x8] sm:$0xff] }
 0x146   : > { %1205 = vmatpush.msra.mxu2 %v1188_v14 }
 0x147   : > { %1467 = vmatpush.msra.mxu3 %v1188_v14 }
 0x148   : > { %843 = vmatmul.f32.gmra.mxu1 %v769_v6  ;;  %1206 = vmatpush.msra.mxu2 %v1187_v12 }
 0x149   : > { %1468 = vmatpush.msra.mxu3 %v1187_v12 }
 0x14a   : > { %1207 = vmatpush.msra.mxu2 %v1186_v7 }
 0x14b   : > { %1469 = vmatpush.msra.mxu3 %v1186_v7 }
 0x14c   : > { %1208 = vmatpush.msra.mxu2 %v1185_v3 }
 0x14d   : > { %1470 = vmatpush.msra.mxu3 %v1185_v3 }
 0x14e   : > { %1209 = vmatpush.msra.mxu2 %v1184_v49 }
 0x14f   : > { %1471 = vmatpush.msra.mxu3 %v1184_v49 }
 0x150   : > { %1210 = vmatpush.msra.mxu2 %v1183_v16 }
 0x151   : > { %1472 = vmatpush.msra.mxu3 %v1183_v16 }
 0x152   : > { %1211 = vmatpush.msra.mxu2 %v1182_v22 }
 0x153   : > { %1473 = vmatpush.msra.mxu3 %v1182_v22 }
 0x154   : > { %1212 = vmatpush.msra.mxu2 %v1181_v23 }
 0x155   : > { %1474 = vmatpush.msra.mxu3 %v1181_v23 }
 0x156   : > { %1213 = vmatpush.msra.mxu2 %v1180_v56 }
 0x157   : > { %1475 = vmatpush.msra.mxu3 %v1180_v56 }
 0x158   : > { %1214 = vmatpush.msra.mxu2 %v1179_v24 }
 0x159   : > { %1476 = vmatpush.msra.mxu3 %v1179_v24 }
 0x16c   : > { %v811_v17 = vpop.f32.mrf.mxu1 }
 0x16d   : > { %v2245_v21 = vadd.f32 %v2242_v15, %v811_v17 }
 0x16f   : > { %v1410_v19 = vmul.f32 -1.442695, %v2245_v21 }
 0x171   : > { %1616 = vpow2.f32 %v1410_v19 }
 0x175   : > { %v814_v25 = vpop.f32.mrf.mxu1 }
 0x176   : > { %v2249_v26 = vadd.f32 %v2242_v15, %v814_v25 }
 0x177   : > { %v1617_v27 = vpop.eup %1616 }
 0x178   : > { %v1411_v28 = vmul.f32 -1.442695, %v2249_v26  ;;  %v847_v29 = vpop.f32.mrf.mxu3  ;;  %v907_v31 = vadd.f32 1.0, %v1617_v27 }
 0x179   : > { %v2253_v32 = vadd.f32 %v2242_v15, %v847_v29 }
 0x17a   : > { %1618 = vpow2.f32 %v1411_v28  ;;  %v932_v44 = vand.u32 2147483647, %v907_v31  ;;  %v934_v30 = vand.u32 2147483648, %v907_v31  ;;  %vm928_vm1 = vweird.f32 %v907_v31 }
 0x17b   : > { %1620 = vrcp.f32 %v907_v31  ;;  %v1422_v18 = vmul.f32 -1.442695, %v2253_v32 }
 0x17c   : > { %vm2274_vm2 = vcmp.eq.f32.partialorder %v932_v44, 8.507059e+37  ;;  %v935_v57 = vor.u32 1.1754944e-38, %v934_v30 }
 0x17d   : > { %1622 = vpow2.f32 %v1422_v18  ;;  %v817_v34 = vpop.f32.mrf.mxu1 }
 0x17e   : > { %v2257_v46 = vadd.f32 %v2242_v15, %v817_v34 }
 0x180   : > { %v1619_v35 = vpop.eup %1618  ;;  %v1412_v33 = vmul.f32 -1.442695, %v2257_v46  ;;  %v850_v36 = vpop.f32.mrf.mxu3 }
 0x181   : > { %v1621_v37 = vpop.eup %1620  ;;  %v2260_v40 = vadd.f32 1.0, %v1619_v35  ;;  %v2263_v41 = vadd.f32 %v2242_v15, %v850_v36 }
 0x182   : > { %1624 = vpow2.f32 %v1412_v33  ;;  %v924_v39 = vmul.f32 %v1621_v37, %v907_v31  ;;  %vm929_vm0 = vweird.f32 %v1621_v37 }
 0x183   : > { %v1623_v42 = vpop.eup %1622  ;;  %1626 = vrcp.f32 %v2260_v40  ;;  %v1423_v43 = vmul.f32 -1.442695, %v2263_v41  ;;  %v947_v45 = vand.u32 2147483647, %v2260_v40  ;;  %vm943_vm3 = vweird.f32 %v2260_v40  ;;  %vm930_vm4 = vmor %vm928_vm1, %vm929_vm0 }
 0x184   : > { %v2267_v61 = vadd.f32 1.0, %v1623_v42  ;;  %v925_v52 = vsub.f32 1.0, %v924_v39  ;;  %v949_v20 = vand.u32 2147483648, %v2260_v40 }
 0x185   : > { %1628 = vpow2.f32 %v1423_v43  ;;  %v820_v38 = vpop.f32.mrf.mxu1  ;;  %vm2287_vm5 = vcmp.eq.f32.partialorder %v947_v45, 8.507059e+37 }
 0x186   : > { %1630 = vrcp.f32 %v2267_v61  ;;  %v2272_v47 = vadd.f32 %v2242_v15, %v820_v38  ;;  %v926_v48 = vmul.f32 %v1621_v37, %v925_v52  ;;  %v1112_v63 = vand.u32 2147483647, %v2267_v61 }
 0x187   : > { %v1114_v4 = vand.u32 2147483648, %v2267_v61  ;;  %vm1108_vm6 = vweird.f32 %v2267_v61  ;;  %v950_v16 = vor.u32 1.1754944e-38, %v949_v20 }
 0x188   : > { %v1625_v51 = vpop.eup %1624  ;;  %v853_v54 = vpop.f32.mrf.mxu3  ;;  %v1413_v59 = vmul.f32 -1.442695, %v2272_v47  ;;  %v927_v62 = vadd.f32 %v1621_v37, %v926_v48  ;;  %vm2306_vm9 = vcmp.eq.f32.partialorder %v1112_v63, 8.507059e+37 }
 0x189   : > { %v1627_v58 = vpop.eup %1626  ;;  %v2279_v50 = vadd.f32 1.0, %v1625_v51  ;;  %v2283_v60 = vadd.f32 %v2242_v15, %v853_v54  ;;  %v1115_v17 = vor.u32 1.1754944e-38, %v1114_v4 }
 0x18a   : > { %v939_v55 = vmul.f32 %v1627_v58, %v2260_v40  ;;  %v931_v6 = vsel %vm930_vm4, %v1621_v37, %v927_v62  ;;  %vm944_vm7 = vweird.f32 %v1627_v58 }
 0x18b   : > { %v1629_v2 = vpop.eup %1628  ;;  %1632 = vrcp.f32 %v2279_v50  ;;  %v1424_v5 = vmul.f32 -1.442695, %v2283_v60  ;;  %v936_v10 = vsel %vm2274_vm2, %v935_v57, %v931_v6  ;;  %v962_v23 = vand.u32 2147483647, %v2279_v50  ;;  %vm945_vm10 = vmor %vm943_vm3, %vm944_vm7 }
 0x18c   : > { %v1631_v8 = vpop.eup %1630  ;;  %v2295_v9 = vadd.f32 1.0, %v1629_v2  ;;  %1634 = vpow2.f32 %v1413_v59  ;;  %v940_v11 = vsub.f32 1.0, %v939_v55  ;;  %v1163_v14 = vmul.f32 %v936_v10, %v2245_v21 }
 0x18d   : > { %v1104_v13 = vmul.f32 %v1631_v8, %v2267_v61  ;;  %1636 = vpow2.f32 %v1424_v5  ;;  %v823_v53 = vpop.f32.mrf.mxu1  ;;  %vm1109_vm8 = vweird.f32 %v1631_v8  ;;  %v964_v27 = vand.u32 2147483648, %v2279_v50 }
 0x18e   : > { %1638 = vrcp.f32 %v2295_v9  ;;  %v2304_v12 = vadd.f32 %v2242_v15, %v823_v53  ;;  %v941_v7 = vmul.f32 %v1627_v58, %v940_v11  ;;  %1215 = vmatmul.f32.vlgmr.msra.gmra.mxu2 %v1163_v14  ;;  %vm1123_vm11 = vweird.f32 %v2295_v9  ;;  %vm2322_vm12 = vmor %vm1108_vm6, %vm1109_vm8 }
 0x18f   : > { %v1105_v3 = vsub.f32 1.0, %v1104_v13  ;;  %v1127_v34 = vand.u32 2147483647, %v2295_v9  ;;  %v1129_v52 = vand.u32 2147483648, %v2295_v9  ;;  %vm958_vm15 = vweird.f32 %v2279_v50 }
 0x190   : > { %v1414_v22 = vmul.f32 -1.442695, %v2304_v12  ;;  %v856_v19 = vpop.f32.mrf.mxu3  ;;  %v942_v21 = vadd.f32 %v1627_v58, %v941_v7  ;;  %v965_v62 = vor.u32 1.1754944e-38, %v964_v27  ;;  %vm963_vm1 = vcmp.eq.f32.partialorder %v962_v23, 8.507059e+37 }
 0x191   : > { %v1633_v56 = vpop.eup %1632  ;;  %v1106_v24 = vmul.f32 %v1631_v8, %v1105_v3  ;;  %v2313_v25 = vadd.f32 %v2242_v15, %v856_v19  ;;  %v1130_v0 = vor.u32 1.1754944e-38, %v1129_v52  ;;  %vm1128_vm3 = vcmp.eq.f32.partialorder %v1127_v34, 8.507059e+37 }
 0x192   : > { %v1635_v28 = vpop.eup %1634  ;;  %1640 = vpow2.f32 %v1414_v22  ;;  %v946_v31 = vsel %vm945_vm10, %v1627_v58, %v942_v21  ;;  %v954_v18 = vmul.f32 %v1633_v56, %v2279_v50  ;;  %vm959_vm13 = vweird.f32 %v1633_v56 }
 0x193   : > { %v1637_v35 = vpop.eup %1636  ;;  %v1107_v33 = vadd.f32 %v1631_v8, %v1106_v24  ;;  %v2328_v36 = vadd.f32 1.0, %v1635_v28  ;;  %v1425_v37 = vmul.f32 -1.442695, %v2313_v25  ;;  %v951_v40 = vsel %vm2287_vm5, %v950_v16, %v946_v31  ;;  %vm960_vm0 = vmor %vm958_vm15, %vm959_vm13 }
 0x194   : > { %v1639_v39 = vpop.eup %1638  ;;  %v2333_v42 = vadd.f32 1.0, %v1637_v35  ;;  %v1164_v43 = vmul.f32 %v951_v40, %v2249_v26  ;;  %v955_v61 = vsub.f32 1.0, %v954_v18 }
 0x195   : > { %v1111_v44 = vsel %vm2322_vm12, %v1631_v8, %v1107_v33  ;;  %1642 = vrcp.f32 %v2328_v36  ;;  %v826_v30 = vpop.f32.mrf.mxu1  ;;  %v1119_v38 = vmul.f32 %v1639_v39, %v2295_v9  ;;  %vm1124_vm14 = vweird.f32 %v1639_v39 }
 0x196   : > { %v1116_v45 = vsel %vm2306_vm9, %v1115_v17, %v1111_v44  ;;  %1644 = vrcp.f32 %v2333_v42  ;;  %v2345_v48 = vadd.f32 %v2242_v15, %v826_v30  ;;  %v956_v26 = vmul.f32 %v1633_v56, %v955_v61  ;;  %1218 = vmatmul.f32.gmra.mxu2 %v1164_v43  ;;  %vm2355_vm2 = vmor %vm1123_vm11, %vm1124_vm14 }
 0x197   : > { %v1175_v51 = vmul.f32 %v1116_v45, %v2253_v32  ;;  %1646 = vpow2.f32 %v1425_v37  ;;  %v1120_v54 = vsub.f32 1.0, %v1119_v38  ;;  %v977_v8 = vand.u32 2147483647, %v2328_v36 }
 0x198   : > { %v1641_v1 = vpop.eup %1640  ;;  %v1415_v57 = vmul.f32 -1.442695, %v2345_v48  ;;  %v957_v58 = vadd.f32 %v1633_v56, %v956_v26  ;;  %v979_v9 = vand.u32 2147483648, %v2328_v36  ;;  %vm1138_vm4 = vweird.f32 %v2333_v42 }
 0x199   : > { %v2350_v59 = vadd.f32 1.0, %v1641_v1  ;;  %1251 = vmatmul.f32.vlgmr.msra.gmra.mxu3 %v1175_v51  ;;  %v1121_v63 = vmul.f32 %v1639_v39, %v1120_v54  ;;  %v1144_v14 = vand.u32 2147483648, %v2333_v42  ;;  %v1142_v22 = vand.u32 2147483647, %v2333_v42 }
 0x19a   : > { %1648 = vpow2.f32 %v1415_v57  ;;  %v961_v55 = vsel %vm960_vm0, %v1633_v56, %v957_v58  ;;  %vm973_vm7 = vweird.f32 %v2328_v36  ;;  %v980_v18 = vor.u32 1.1754944e-38, %v979_v9 }
 0x19b   : > { %v1643_v20 = vpop.eup %1642  ;;  %1650 = vrcp.f32 %v2350_v59  ;;  %v966_v50 = vsel %vm963_vm1, %v965_v62, %v961_v55  ;;  %v1122_v2 = vadd.f32 %v1639_v39, %v1121_v63  ;;  %v1145_v29 = vor.u32 1.1754944e-38, %v1144_v14 }
 0x19c   : > { %v1645_v4 = vpop.eup %1644  ;;  %v1165_v5 = vmul.f32 %v966_v50, %v2257_v46  ;;  %v969_v6 = vmul.f32 %v1643_v20, %v2328_v36  ;;  %vm974_vm6 = vweird.f32 %v1643_v20  ;;  %vm1143_vm10 = vcmp.eq.f32.partialorder %v1142_v22, 8.507059e+37 }
 0x19d   : > { %v1647_v10 = vpop.eup %1646  ;;  %v829_v11 = vpop.f32.mrf.mxu1  ;;  %v1126_v13 = vsel %vm2355_vm2, %v1639_v39, %v1122_v2  ;;  %v1134_v53 = vmul.f32 %v1645_v4, %v2333_v42  ;;  %vm1139_vm5 = vweird.f32 %v1645_v4  ;;  %vm975_vm9 = vmor %vm973_vm7, %vm974_vm6  ;;  %vm978_vm11 = vcmp.eq.f32.partialorder %v977_v8, 8.507059e+37 }
 0x19e   : > { %v2369_v7 = vadd.f32 1.0, %v1647_v10  ;;  %v2372_v46 = vadd.f32 %v2242_v15, %v829_v11  ;;  %v1131_v3 = vsel %vm1128_vm3, %v1130_v0, %v1126_v13  ;;  %v970_v49 = vsub.f32 1.0, %v969_v6  ;;  %1221 = vmatmul.f32.gmra.mxu2 %v1165_v5  ;;  %vm2383_vm8 = vmor %vm1138_vm4, %vm1139_vm5 }
 0x19f   : > { %v1176_v16 = vmul.f32 %v1131_v3, %v2263_v41  ;;  %v1135_v17 = vsub.f32 1.0, %v1134_v53  ;;  %v994_v36 = vand.u32 2147483648, %v2350_v59  ;;  %v992_v42 = vand.u32 2147483647, %v2350_v59 }
 0x1a0   : > { %v1649_v19 = vpop.eup %1648  ;;  %1652 = vrcp.f32 %v2369_v7  ;;  %v1416_v21 = vmul.f32 -1.442695, %v2372_v46  ;;  %v971_v23 = vmul.f32 %v1643_v20, %v970_v49  ;;  %vm988_vm13 = vweird.f32 %v2350_v59 }
 0x1a1   : > { %v1651_v56 = vpop.eup %1650  ;;  %v2378_v24 = vadd.f32 1.0, %v1649_v19  ;;  %1254 = vmatmul.f32.gmra.mxu3 %v1176_v16  ;;  %v1136_v27 = vmul.f32 %v1645_v4, %v1135_v17  ;;  %vm1153_vm14 = vweird.f32 %v2369_v7  ;;  %v995_v1 = vor.u32 1.1754944e-38, %v994_v36 }
 0x1a2   : > { %1654 = vpow2.f32 %v1416_v21  ;;  %v972_v41 = vadd.f32 %v1643_v20, %v971_v23  ;;  %v984_v31 = vmul.f32 %v1651_v56, %v2350_v59  ;;  %vm989_vm12 = vweird.f32 %v1651_v56 }
 0x1a3   : > { %1656 = vrcp.f32 %v2378_v24  ;;  %v1137_v34 = vadd.f32 %v1645_v4, %v1136_v27  ;;  %v1159_v57 = vand.u32 2147483648, %v2369_v7  ;;  %vm990_vm15 = vmor %vm988_vm13, %vm989_vm12  ;;  %v1157_v59 = vand.u32 2147483647, %v2369_v7 }
 0x1a4   : > { %v976_v35 = vsel %vm975_vm9, %v1643_v20, %v972_v41  ;;  %v985_v33 = vsub.f32 1.0, %v984_v31  ;;  %vm993_vm1 = vcmp.eq.f32.partialorder %v992_v42, 8.507059e+37  ;;  %v1009_v6 = vand.u32 2147483648, %v2378_v24 }
 0x1a5   : > { %v832_v37 = vpop.f32.mrf.mxu1  ;;  %v981_v40 = vsel %vm978_vm11, %v980_v18, %v976_v35  ;;  %v1141_v39 = vsel %vm2383_vm8, %v1645_v4, %v1137_v34  ;;  %v1160_v50 = vor.u32 1.1754944e-38, %v1159_v57  ;;  %vm1158_vm3 = vcmp.eq.f32.partialorder %v1157_v59, 8.507059e+37 }
 0x1a6   : > { %v1653_v43 = vpop.eup %1652  ;;  %v2394_v61 = vadd.f32 %v2242_v15, %v832_v37  ;;  %v1166_v52 = vmul.f32 %v981_v40, %v2272_v47  ;;  %v1146_v44 = vsel %vm1143_vm10, %v1145_v29, %v1141_v39  ;;  %v986_v30 = vmul.f32 %v1651_v56, %v985_v33 }
 0x1a7   : > { %v1177_v38 = vmul.f32 %v1146_v44, %v2283_v60  ;;  %v1149_v45 = vmul.f32 %v1653_v43, %v2369_v7  ;;  %vm1154_vm0 = vweird.f32 %v1653_v43  ;;  %vm1003_vm5 = vweird.f32 %v2378_v24 }
 0x1a8   : > { %v1655_v26 = vpop.eup %1654  ;;  %v1417_v51 = vmul.f32 -1.442695, %v2394_v61  ;;  %1224 = vmatmul.f32.gmra.mxu2 %v1166_v52  ;;  %v987_v54 = vadd.f32 %v1651_v56, %v986_v30  ;;  %vm2412_vm2 = vmor %vm1153_vm14, %vm1154_vm0  ;;  %v1010_v16 = vor.u32 1.1754944e-38, %v1009_v6 }
 0x1a9   : > { %v1657_v58 = vpop.eup %1656  ;;  %v2403_v47 = vadd.f32 1.0, %v1655_v26  ;;  %1257 = vmatmul.f32.gmra.mxu3 %v1177_v38  ;;  %v1150_v60 = vsub.f32 1.0, %v1149_v45 }
 0x1aa   : > { %1658 = vpow2.f32 %v1417_v51  ;;  %v991_v62 = vsel %vm990_vm15, %v1651_v56, %v987_v54  ;;  %v999_v63 = vmul.f32 %v1657_v58, %v2378_v24  ;;  %vm1004_vm4 = vweird.f32 %v1657_v58 }
 0x1ab   : > { %1660 = vrcp.f32 %v2403_v47  ;;  %v996_v55 = vsel %vm993_vm1, %v995_v1, %v991_v62  ;;  %v1151_v32 = vmul.f32 %v1653_v43, %v1150_v60  ;;  %vm1005_vm6 = vmor %vm1003_vm5, %vm1004_vm4  ;;  %v1022_v41 = vand.u32 2147483647, %v2403_v47 }
 0x1ac   : > { %v1167_v0 = vmul.f32 %v996_v55, %v2304_v12  ;;  %v1000_v2 = vsub.f32 1.0, %v999_v63  ;;  %v1007_v12 = vand.u32 2147483647, %v2378_v24  ;;  %v1024_v24 = vand.u32 2147483648, %v2403_v47 }
 0x1ad   : > { %v835_v4 = vpop.f32.mrf.mxu1  ;;  %v1152_v5 = vadd.f32 %v1653_v43, %v1151_v32  ;;  %vm1018_vm9 = vweird.f32 %v2403_v47  ;;  %vm1023_vm11 = vcmp.eq.f32.partialorder %v1022_v41, 8.507059e+37 }
 0x1ae   : > { %v2418_v8 = vadd.f32 %v2242_v15, %v835_v4  ;;  %v1001_v9 = vmul.f32 %v1657_v58, %v1000_v2  ;;  %vm1008_vm7 = vcmp.eq.f32.partialorder %v1007_v12, 8.507059e+37  ;;  %v1025_v34 = vor.u32 1.1754944e-38, %v1024_v24 }
 0x1af   : > { %v1156_v10 = vsel %vm2412_vm2, %v1653_v43, %v1152_v5 }
 0x1b0   : > { %v1659_v11 = vpop.eup %1658  ;;  %v1418_v13 = vmul.f32 -1.442695, %v2418_v8  ;;  %1227 = vmatmul.f32.gmra.mxu2 %v1167_v0  ;;  %v1161_v53 = vsel %vm1158_vm3, %v1160_v50, %v1156_v10  ;;  %v1002_v14 = vadd.f32 %v1657_v58, %v1001_v9 }
 0x1b1   : > { %v1661_v7 = vpop.eup %1660  ;;  %v914_v3 = vadd.f32 1.0, %v1659_v11  ;;  %v1178_v49 = vmul.f32 %v1161_v53, %v2313_v25 }
 0x1b2   : > { %1662 = vpow2.f32 %v1418_v13  ;;  %v1006_v17 = vsel %vm1005_vm6, %v1657_v58, %v1002_v14  ;;  %v1014_v22 = vmul.f32 %v1661_v7, %v2403_v47  ;;  %vm1019_vm8 = vweird.f32 %v1661_v7 }
 0x1b3   : > { %1664 = vrcp.f32 %v914_v3  ;;  %1260 = vmatmul.f32.gmra.mxu3 %v1178_v49  ;;  %v1011_v19 = vsel %vm1008_vm7, %v1010_v16, %v1006_v17  ;;  %vm1020_vm10 = vmor %vm1018_vm9, %vm1019_vm8  ;;  %v1039_v42 = vand.u32 2147483648, %v914_v3  ;;  %v1037_v44 = vand.u32 2147483647, %v914_v3 }
 0x1b4   : > { %v1168_v21 = vmul.f32 %v1011_v19, %v2345_v48  ;;  %v1015_v23 = vsub.f32 1.0, %v1014_v22  ;;  %vm1033_vm13 = vweird.f32 %v914_v3 }
 0x1b5   : > { %v838_v56 = vpop.f32.mrf.mxu1  ;;  %v1040_v54 = vor.u32 1.1754944e-38, %v1039_v42  ;;  %vm1038_vm15 = vcmp.eq.f32.partialorder %v1037_v44, 8.507059e+37 }
 0x1b6   : > { %v2430_v27 = vadd.f32 %v2242_v15, %v838_v56  ;;  %v1016_v25 = vmul.f32 %v1661_v7, %v1015_v23 }
 0x1b8   : > { %v1663_v28 = vpop.eup %1662  ;;  %v1419_v29 = vmul.f32 -1.442695, %v2430_v27  ;;  %1230 = vmatmul.f32.gmra.mxu2 %v1168_v21  ;;  %v1017_v31 = vadd.f32 %v1661_v7, %v1016_v25 }
 0x1b9   : > { %v1665_v18 = vpop.eup %1664  ;;  %v915_v48 = vadd.f32 1.0, %v1663_v28 }
 0x1ba   : > { %1666 = vpow2.f32 %v1419_v29  ;;  %v1021_v35 = vsel %vm1020_vm10, %v1661_v7, %v1017_v31  ;;  %v1029_v33 = vmul.f32 %v1665_v18, %v914_v3  ;;  %vm1034_vm12 = vweird.f32 %v1665_v18 }
 0x1bb   : > { %1668 = vrcp.f32 %v915_v48  ;;  %v1026_v36 = vsel %vm1023_vm11, %v1025_v34, %v1021_v35  ;;  %vm1035_vm14 = vmor %vm1033_vm13, %vm1034_vm12  ;;  %v1054_v59 = vand.u32 2147483648, %v915_v48  ;;  %v1052_v55 = vand.u32 2147483647, %v915_v48 }
 0x1bc   : > { %v1169_v37 = vmul.f32 %v1026_v36, %v2372_v46  ;;  %v1030_v40 = vsub.f32 1.0, %v1029_v33  ;;  %vm1048_vm1 = vweird.f32 %v915_v48 }
 0x1bd   : > { %v841_v39 = vpop.f32.mrf.mxu1  ;;  %v1055_v4 = vor.u32 1.1754944e-38, %v1054_v59  ;;  %vm1053_vm3 = vcmp.eq.f32.partialorder %v1052_v55, 8.507059e+37 }
 0x1be   : > { %v2437_v43 = vadd.f32 %v2242_v15, %v841_v39  ;;  %v1031_v52 = vmul.f32 %v1665_v18, %v1030_v40  ;;  %v1551_v39 = vld [vmem:[%s2510_s6] ss:$0 sm:$0xff] }
 0x1c0   : > { %v1667_v30 = vpop.eup %1666  ;;  %v1420_v38 = vmul.f32 -1.442695, %v2437_v43  ;;  %1233 = vmatmul.f32.gmra.mxu2 %v1169_v37  ;;  %v1032_v45 = vadd.f32 %v1665_v18, %v1031_v52 }
 0x1c1   : > { %v1669_v26 = vpop.eup %1668  ;;  %v916_v51 = vadd.f32 1.0, %v1667_v30 }
 0x1c2   : > { %1670 = vpow2.f32 %v1420_v38  ;;  %v1036_v46 = vsel %vm1035_vm14, %v1665_v18, %v1032_v45  ;;  %v1044_v1 = vmul.f32 %v1669_v26, %v915_v48  ;;  %vm1049_vm0 = vweird.f32 %v1669_v26 }
 0x1c3   : > { %1672 = vrcp.f32 %v916_v51  ;;  %v1041_v57 = vsel %vm1038_vm15, %v1040_v54, %v1036_v46  ;;  %vm1050_vm2 = vmor %vm1048_vm1, %vm1049_vm0  ;;  %v1069_v12 = vand.u32 2147483648, %v916_v51  ;;  %v1067_v11 = vand.u32 2147483647, %v916_v51 }
 0x1c4   : > { %v1170_v58 = vmul.f32 %v1041_v57, %v2394_v61  ;;  %v1045_v47 = vsub.f32 1.0, %v1044_v1  ;;  %vm1063_vm5 = vweird.f32 %v916_v51  ;;  %vm1264_vm0 = vcmask 130048  }
 0x1c5   : > { %v844_v60 = vpop.f32.mrf.mxu1  ;;  %v1070_v3 = vor.u32 1.1754944e-38, %v1069_v12  ;;  %vm1068_vm7 = vcmp.eq.f32.partialorder %v1067_v11, 8.507059e+37 }
 0x1c6   : > { %v2442_v62 = vadd.f32 %v2242_v15, %v844_v60  ;;  %v1046_v63 = vmul.f32 %v1669_v26, %v1045_v47 }
 0x1c8   : > { %v1671_v32 = vpop.eup %1670  ;;  %v1421_v0 = vmul.f32 -1.442695, %v2442_v62  ;;  %1236 = vmatmul.f32.gmra.mxu2 %v1170_v58  ;;  %v1047_v20 = vadd.f32 %v1669_v26, %v1046_v63 }
 0x1c9   : > { %v1673_v50 = vpop.eup %1672  ;;  %v917_v2 = vadd.f32 1.0, %v1671_v32 }
 0x1ca   : > { %1674 = vpow2.f32 %v1421_v0  ;;  %v1051_v61 = vsel %vm1050_vm2, %v1669_v26, %v1047_v20  ;;  %v1059_v5 = vmul.f32 %v1673_v50, %v916_v51  ;;  %vm1064_vm4 = vweird.f32 %v1673_v50 }
 0x1cb   : > { %1676 = vrcp.f32 %v917_v2  ;;  %v1056_v15 = vsel %vm1053_vm3, %v1055_v4, %v1051_v61  ;;  %vm1065_vm6 = vmor %vm1063_vm5, %vm1064_vm4  ;;  %v1084_v19 = vand.u32 2147483648, %v917_v2  ;;  %v1082_v23 = vand.u32 2147483647, %v917_v2 }
 0x1cc   : > { %v1171_v6 = vmul.f32 %v1056_v15, %v2418_v8  ;;  %v1060_v9 = vsub.f32 1.0, %v1059_v5  ;;  %vm1078_vm9 = vweird.f32 %v917_v2 }
 0x1cd   : > { %v1085_v25 = vor.u32 1.1754944e-38, %v1084_v19  ;;  %vm1083_vm11 = vcmp.eq.f32.partialorder %v1082_v23, 8.507059e+37 }
 0x1ce   : > { %v1061_v10 = vmul.f32 %v1673_v50, %v1060_v9 }
 0x1d0   : > { %v1675_v13 = vpop.eup %1674  ;;  %1239 = vmatmul.f32.gmra.mxu2 %v1171_v6  ;;  %v1062_v53 = vadd.f32 %v1673_v50, %v1061_v10 }
 0x1d1   : > { %v1677_v14 = vpop.eup %1676  ;;  %v918_v7 = vadd.f32 1.0, %v1675_v13 }
 0x1d2   : > { %v1066_v49 = vsel %vm1065_vm6, %v1673_v50, %v1062_v53  ;;  %v1074_v16 = vmul.f32 %v1677_v14, %v917_v2  ;;  %vm1079_vm8 = vweird.f32 %v1677_v14 }
 0x1d3   : > { %1678 = vrcp.f32 %v918_v7  ;;  %v1071_v17 = vsel %vm1068_vm7, %v1070_v3, %v1066_v49  ;;  %vm1080_vm10 = vmor %vm1078_vm9, %vm1079_vm8  ;;  %v1097_v34 = vand.u32 2147483647, %v918_v7  ;;  %vm1093_vm13 = vweird.f32 %v918_v7 }
 0x1d4   : > { %v1172_v8 = vmul.f32 %v1071_v17, %v2430_v27  ;;  %v1075_v22 = vsub.f32 1.0, %v1074_v16  ;;  %v1099_v27 = vand.u32 2147483648, %v918_v7 }
 0x1d5   : > { %vm1098_vm15 = vcmp.eq.f32.partialorder %v1097_v34, 8.507059e+37 }
 0x1d6   : > { %v1076_v21 = vmul.f32 %v1677_v14, %v1075_v22  ;;  %v1100_v33 = vor.u32 1.1754944e-38, %v1099_v27 }
 0x1d8   : > { %1242 = vmatmul.f32.gmra.mxu2 %v1172_v8  ;;  %v1077_v56 = vadd.f32 %v1677_v14, %v1076_v21 }
 0x1d9   : > { %v1679_v24 = vpop.eup %1678 }
 0x1da   : > { %v1081_v41 = vsel %vm1080_vm10, %v1677_v14, %v1077_v56  ;;  %v1089_v28 = vmul.f32 %v1679_v24, %v918_v7  ;;  %vm1094_vm12 = vweird.f32 %v1679_v24 }
 0x1db   : > { %v1086_v29 = vsel %vm1083_vm11, %v1085_v25, %v1081_v41  ;;  %vm1095_vm14 = vmor %vm1093_vm13, %vm1094_vm12 }
 0x1dc   : > { %v1173_v31 = vmul.f32 %v1086_v29, %v2437_v43  ;;  %v1090_v18 = vsub.f32 1.0, %v1089_v28 }
 0x1de   : > { %v1091_v48 = vmul.f32 %v1679_v24, %v1090_v18 }
 0x1e0   : > { %1245 = vmatmul.f32.gmra.mxu2 %v1173_v31  ;;  %v1092_v35 = vadd.f32 %v1679_v24, %v1091_v48 }
 0x1e2   : > { %v1096_v36 = vsel %vm1095_vm14, %v1679_v24, %v1092_v35 }
 0x1e3   : > { %v1101_v37 = vsel %vm1098_vm15, %v1100_v33, %v1096_v36 }
 0x1e4   : > { %v1174_v40 = vmul.f32 %v1101_v37, %v2442_v62 }
 0x1e8   : > { %1248 = vmatmul.f32.gmra.mxu2 %v1174_v40 }
 0x211   : > { %v1216_v42 = vpop.f32.mrf.mxu2 }
 0x212   : > { %v1217_v43 = vadd.f32 %v1551_v39, %v1216_v42 }
 0x214   : > { %1265 = vst.msk [vmem:[%s2457_s21] sm:$0xff] %vm1264_vm0, %v1217_v43 }
 0x219   : > { %v1219_v52 = vpop.f32.mrf.mxu2 }
 0x21a   : > { %v1220_v44 = vadd.f32 %v1551_v39, %v1219_v52 }
 0x21c   : > { %v1252_v30 = vpop.f32.mrf.mxu3  ;;  %1266 = vst.msk [vmem:[%s2457_s21 + $0x8] sm:$0xff] %vm1264_vm0, %v1220_v44 }
 0x21d   : > { %v1253_v38 = vadd.f32 %v1551_v39, %v1252_v30 }
 0x21f   : > { %1277 = vst.msk [vmem:[%s2457_s21 + $0x60] sm:$0xff] %vm1264_vm0, %v1253_v38 }
 0x221   : > { %v1222_v45 = vpop.f32.mrf.mxu2 }
 0x222   : > { %v1223_v26 = vadd.f32 %v1551_v39, %v1222_v45 }
 0x224   : > { %v1255_v51 = vpop.f32.mrf.mxu3  ;;  %1267 = vst.msk [vmem:[%s2457_s21 + $0x10] sm:$0xff] %vm1264_vm0, %v1223_v26 }
 0x225   : > { %v1256_v54 = vadd.f32 %v1551_v39, %v1255_v51 }
 0x227   : > { %1278 = vst.msk [vmem:[%s2457_s21 + $0x68] sm:$0xff] %vm1264_vm0, %v1256_v54 }
 0x22b   : > { %v1225_v46 = vpop.f32.mrf.mxu2 }
 0x22c   : > { %v1226_v1 = vadd.f32 %v1551_v39, %v1225_v46  ;;  %v1258_v57 = vpop.f32.mrf.mxu3 }
 0x22d   : > { %v1259_v58 = vadd.f32 %v1551_v39, %v1258_v57 }
 0x22e   : > { %1268 = vst.msk [vmem:[%s2457_s21 + $0x18] sm:$0xff] %vm1264_vm0, %v1226_v1 }
 0x22f   : > { %1279 = vst.msk [vmem:[%s2457_s21 + $0x70] sm:$0xff] %vm1264_vm0, %v1259_v58 }
 0x233   : > { %v1228_v47 = vpop.f32.mrf.mxu2 }
 0x234   : > { %v1229_v60 = vadd.f32 %v1551_v39, %v1228_v47 }
 0x236   : > { %1269 = vst.msk [vmem:[%s2457_s21 + $0x20] sm:$0xff] %vm1264_vm0, %v1229_v60  ;;  %v1261_v59 = vpop.f32.mrf.mxu3 }
 0x237   : > { %v1262_v62 = vadd.f32 %v1551_v39, %v1261_v59 }
 0x239   : > { %1280 = vst.msk [vmem:[%s2457_s21 + $0x78] sm:$0xff] %vm1264_vm0, %v1262_v62 }
 0x23b   : > { %v1231_v63 = vpop.f32.mrf.mxu2 }
 0x23c   : > { %v1232_v55 = vadd.f32 %v1551_v39, %v1231_v63 }
 0x23e   : > { %1270 = vst.msk [vmem:[%s2457_s21 + $0x28] sm:$0xff] %vm1264_vm0, %v1232_v55 }
 0x243   : > { %v1234_v32 = vpop.f32.mrf.mxu2 }
 0x244   : > { %v1235_v0 = vadd.f32 %v1551_v39, %v1234_v32 }
 0x246   : > { %1271 = vst.msk [vmem:[%s2457_s21 + $0x30] sm:$0xff] %vm1264_vm0, %v1235_v0 }
 0x24b   : > { %v1237_v20 = vpop.f32.mrf.mxu2 }
 0x24c   : > { %v1238_v50 = vadd.f32 %v1551_v39, %v1237_v20 }
 0x24e   : > { %1272 = vst.msk [vmem:[%s2457_s21 + $0x38] sm:$0xff] %vm1264_vm0, %v1238_v50 }
 0x253   : > { %v1240_v2 = vpop.f32.mrf.mxu2 }
 0x254   : > { %v1241_v4 = vadd.f32 %v1551_v39, %v1240_v2 }
 0x256   : > { %1273 = vst.msk [vmem:[%s2457_s21 + $0x40] sm:$0xff] %vm1264_vm0, %v1241_v4 }
 0x25b   : > { %v1243_v61 = vpop.f32.mrf.mxu2 }
 0x25c   : > { %v1244_v5 = vadd.f32 %v1551_v39, %v1243_v61 }
 0x25e   : > { %1274 = vst.msk [vmem:[%s2457_s21 + $0x48] sm:$0xff] %vm1264_vm0, %v1244_v5 }
 0x263   : > { %v1246_v15 = vpop.f32.mrf.mxu2 }
 0x264   : > { %v1247_v6 = vadd.f32 %v1551_v39, %v1246_v15 }
 0x266   : > { %1275 = vst.msk [vmem:[%s2457_s21 + $0x50] sm:$0xff] %vm1264_vm0, %v1247_v6 }
 0x26b   : > { %v1249_v9 = vpop.f32.mrf.mxu2 }
 0x26c   : > { %v1250_v12 = vadd.f32 %v1551_v39, %v1249_v9 }
 0x26e   : > { %1276 = vst.msk [vmem:[%s2457_s21 + $0x58] sm:$0xff] %vm1264_vm0, %v1250_v12 }
 0x26f PF: > { %p19_p4 = scmp.ge.s32.totalorder %s1955_s10, 4   ;;  %s2551_s24 = smov %s1834_s25 }
 0x270   : > { %s2552_s25 = smov %s1838_s26  ;;  %s2553_s26 = smov %s1970_s15 }
 0x271   : > { %s2554_s27 = smov %s1955_s10  ;;  %21 = sbr.rel (!%p19_p4) target bundleno = 5 (0x5), region = 100 }
 0x276   :  { %1303 = vsyncpa [#allocation3], 1 }
 0x277   :  { %1305 = vsyncpa [#allocation3 + $0x1], 1 }
 0x278   :  { %1306 = vsyncpa [#allocation5], 1 }
 0x279   :  { %1307 = vsyncpa [#allocation8], 1 }

</bundles_post_ra>
